<compile_context>
chip_gen: v7x
topology: tpu7x:2x2x1
jax: 0.10.0
libtpu: 0.0.40
codegen_flags: <defaults>
</compile_context>

<pallas_src>
import functools
import math

import jax
import jax.numpy as jnp
import numpy as np
from jax.experimental import pallas as pl
from jax.experimental.pallas import tpu as pltpu

NEG_INF_FILL = -1e32   # matches torch masked_fill_(attn_mask == 0, -1e+32)
LN_EPS = 1e-5          # PyTorch nn.LayerNorm default


def _layer_norm(x, gamma, beta):
    mu = jnp.mean(x, axis=-1, keepdims=True)
    xc = x - mu
    var = jnp.mean(xc * xc, axis=-1, keepdims=True)
    return xc / jnp.sqrt(var + LN_EPS) * gamma + beta


def _softmax_last(x):
    m = jnp.max(x, axis=-1, keepdims=True)
    e = jnp.exp(x - m)
    return e / jnp.sum(e, axis=-1, keepdims=True)


def _encoder_layer_kernel(n_heads, d_k, pre_lnorm,
                          src_ref, rec_ref, mask_ref,
                          wq_ref, wk_ref, wv_ref, wp_ref, bp_ref,
                          w1_ref, b1_ref, w2_ref, b2_ref,
                          ln1g_ref, ln1b_ref, ln2g_ref, ln2b_ref,
                          out_ref):
    src = src_ref[0].astype(jnp.float32)     # (Sq, D)
    rec = rec_ref[0].astype(jnp.float32)     # (Sk, D)
    mask = mask_ref[0].astype(jnp.float32)   # (Sq, Sk)

    ln1g, ln1b = ln1g_ref[...], ln1b_ref[...]
    ln2g, ln2b = ln2g_ref[...], ln2b_ref[...]

    inv_scale = 1.0 / math.sqrt(d_k)

    def mha(q_in, k_in, v_in):
        # All heads projected with one lane-dense matmul each (no transposes).
        q_all = jnp.dot(q_in, wq_ref[...], preferred_element_type=jnp.float32)
        k_all = jnp.dot(k_in, wk_ref[...], preferred_element_type=jnp.float32)
        v_all = jnp.dot(v_in, wv_ref[...], preferred_element_type=jnp.float32)
        parts = []
        for h in range(n_heads):               # static unroll; n_heads small
            sl = slice(h * d_k, (h + 1) * d_k)
            q_h, k_h, v_h = q_all[:, sl], k_all[:, sl], v_all[:, sl]
            # q_h @ k_h^T via dot_general (contract on d_k of both operands),
            # avoiding an in-kernel transpose of k_h.
            s_h = jax.lax.dot_general(
                q_h, k_h, (((1,), (1,)), ((), ())),
                preferred_element_type=jnp.float32) * inv_scale
            s_h = jnp.where(mask > 0, s_h, NEG_INF_FILL)
            p_h = _softmax_last(s_h)
            parts.append(jnp.dot(p_h, v_h,
                                 preferred_element_type=jnp.float32))
        ctx = jnp.concatenate(parts, axis=-1)   # (Sq, n_heads*d_k), head-major
        return (jnp.dot(ctx, wp_ref[...],
                        preferred_element_type=jnp.float32) + bp_ref[...])

    def ffn(x):
        h1 = jnp.maximum(
            jnp.dot(x, w1_ref[...], preferred_element_type=jnp.float32)
            + b1_ref[...], 0.0)
        return (jnp.dot(h1, w2_ref[...],
                        preferred_element_type=jnp.float32) + b2_ref[...])

    # TODO(synk): dropout1/2/3 are identity here (inference-mode forward).
    if pre_lnorm:
        x = _layer_norm(src, ln1g, ln1b)
        x = x + mha(x, rec, x)
        x = _layer_norm(x, ln2g, ln2b)
        x = x + ffn(x)
        out = x
    else:
        x = src + mha(src, rec, src)
        x = _layer_norm(x, ln1g, ln1b)
        x = x + ffn(x)
        out = _layer_norm(x, ln2g, ln2b)

    out_ref[0] = out.astype(out_ref.dtype)


def encoder_layer_forward(params, src, rec_src, attn_mask=None, *,
                          use_adj_mask=False, pre_lnorm=False):
    B, Sq, D = src.shape
    Sk = rec_src.shape[1]
    n_heads, _, d_k = params["w_q"].shape
    hdk = n_heads * d_k
    d_ff = params["w1_w"].shape[0]

    # ---- wrapper-side weight re-orientation (done once, not per kernel) ----
    wq = jnp.transpose(params["w_q"], (1, 0, 2)).reshape(D, hdk)
    wk = jnp.transpose(params["w_k"], (1, 0, 2)).reshape(D, hdk)
    wv = jnp.transpose(params["w_v"], (1, 0, 2)).reshape(D, hdk)
    wp = params["proj_w"].T                       # (hdk, D)
    bp = params["proj_b"].reshape(1, D)
    w1 = params["w1_w"].T                         # (D, d_ff)
    b1 = params["w1_b"].reshape(1, d_ff)
    w2 = params["w2_w"].T                         # (d_ff, D)
    b2 = params["w2_b"].reshape(1, D)
    ln1g = params["ln1_g"].reshape(1, D)
    ln1b = params["ln1_b"].reshape(1, D)
    ln2g = params["ln2_g"].reshape(1, D)
    ln2b = params["ln2_b"].reshape(1, D)

    # ---- expand mask to (B, Sq, Sk), matching torch masked_fill broadcast ----
    if attn_mask is None:
        mask3 = jnp.ones((B, Sq, Sk), jnp.float32)
    elif use_adj_mask:
        mask3 = attn_mask.astype(jnp.float32)
    else:
        mask3 = jnp.broadcast_to(
            attn_mask.astype(jnp.float32)[:, None, :], (B, Sq, Sk))

    per_batch = [src.astype(jnp.float32), rec_src.astype(jnp.float32), mask3]
    weights = [wq, wk, wv, wp, bp, w1, b1, w2, b2, ln1g, ln1b, ln2g, ln2b]

    def batch_spec(shape):
        nrest = len(shape) - 1
        return pl.BlockSpec((1,) + tuple(shape[1:]),
                            lambda b, _n=nrest: (b,) + (0,) * _n)

    def full_spec(shape):
        nd = len(shape)
        return pl.BlockSpec(tuple(shape), lambda b, _n=nd: (0,) * _n)

    in_specs = [batch_spec(a.shape) for a in per_batch]
    in_specs += [full_spec(a.shape) for a in weights]

    kernel = functools.partial(_encoder_layer_kernel, n_heads, d_k, pre_lnorm)
    out = pl.pallas_call(
        kernel,
        grid=(B,),
        in_specs=in_specs,
        out_specs=batch_spec((B, Sq, D)),
        out_shape=jax.ShapeDtypeStruct((B, Sq, D), jnp.float32),
        compiler_params=pltpu.CompilerParams(
            dimension_semantics=("parallel",)),
    )(*per_batch, *weights)
    return out


# ---------------- pure-JAX reference (mirrors the PyTorch forward) ----------
def encoder_layer_reference(params, src, rec_src, attn_mask=None, *,
                            use_adj_mask=False, pre_lnorm=False):
    d_k = params["w_q"].shape[-1]

    def layer_norm(x, g, b):
        mu = jnp.mean(x, -1, keepdims=True)
        var = jnp.mean((x - mu) ** 2, -1, keepdims=True)
        return (x - mu) / jnp.sqrt(var + LN_EPS) * g + b

    def mha(q_in, k_in, v_in):
        q_s = jnp.einsum("bqd,hdc->hbqc", q_in, params["w_q"])
        k_s = jnp.einsum("bkd,hdc->hbkc", k_in, params["w_k"])
        v_s = jnp.einsum("bkd,hdc->hbkc", v_in, params["w_v"])
        scores = jnp.einsum("hbqc,hbkc->hbqk", q_s, k_s) / np.sqrt(d_k)
        if attn_mask is not None:
            m = attn_mask[None] if use_adj_mask else attn_mask[None, :, None, :]
            scores = jnp.where(m > 0, scores, NEG_INF_FILL)
        attn = jax.nn.softmax(scores, axis=-1)
        ctx = jnp.einsum("hbqk,hbkc->hbqc", attn, v_s)    # (H, B, Sq, d_k)
        B_, Sq_ = ctx.shape[1], ctx.shape[2]
        ctx = jnp.transpose(ctx, (1, 2, 0, 3)).reshape(B_, Sq_, -1)
        return ctx @ params["proj_w"].T + params["proj_b"]

    def ffn(x):
        h = jax.nn.relu(x @ params["w1_w"].T + params["w1_b"])
        return h @ params["w2_w"].T + params["w2_b"]

    g1, b1 = params["ln1_g"], params["ln1_b"]
    g2, b2 = params["ln2_g"], params["ln2_b"]
    if pre_lnorm:
        x = layer_norm(src, g1, b1)
        x = x + mha(x, rec_src, x)
        x = layer_norm(x, g2, b2)
        x = x + ffn(x)
        return x
    x = src + mha(src, rec_src, src)
    x = layer_norm(x, g1, b1)
    x = x + ffn(x)
    return layer_norm(x, g2, b2)


def init_params(key, d_model, n_heads, d_ff):
    d_k = d_model // n_heads
    ks = jax.random.split(key, 14)

    def w(k, shape, fan_in):
        return jax.random.normal(k, shape, jnp.float32) / math.sqrt(fan_in)

    return {
        "w_q": w(ks[0], (n_heads, d_model, d_k), d_model),
        "w_k": w(ks[1], (n_heads, d_model, d_k), d_model),
        "w_v": w(ks[2], (n_heads, d_model, d_k), d_model),
        "proj_w": w(ks[3], (d_model, n_heads * d_k), n_heads * d_k),
        "proj_b": 0.1 * jax.random.normal(ks[4], (d_model,), jnp.float32),
        "w1_w": w(ks[5], (d_ff, d_model), d_model),
        "w1_b": 0.1 * jax.random.normal(ks[6], (d_ff,), jnp.float32),
        "w2_w": w(ks[7], (d_model, d_ff), d_ff),
        "w2_b": 0.1 * jax.random.normal(ks[8], (d_model,), jnp.float32),
        "ln1_g": 1.0 + 0.1 * jax.random.normal(ks[9], (d_model,), jnp.float32),
        "ln1_b": 0.1 * jax.random.normal(ks[10], (d_model,), jnp.float32),
        "ln2_g": 1.0 + 0.1 * jax.random.normal(ks[11], (d_model,), jnp.float32),
        "ln2_b": 0.1 * jax.random.normal(ks[12], (d_model,), jnp.float32),
    }


if __name__ == "__main__":
    B, S, D, H, D_FF = 2, 8, 32, 4, 64
    key = jax.random.PRNGKey(0)
    kp, ksrc, krec, km = jax.random.split(key, 4)

    params = init_params(kp, D, H, D_FF)
    src = jax.random.normal(ksrc, (B, S, D), jnp.float32)
    rec_src = jax.random.normal(krec, (B, S, D), jnp.float32)

    # (B, S) key-padding style mask (1 = attend, 0 = masked out)
    mask2d = jnp.ones((B, S), jnp.float32)
    mask2d = mask2d.at[0, 3].set(0.0).at[1, 5:].set(0.0)

    # (B, S, S) adjacency-style mask with guaranteed self-edges
    adj = (jax.random.uniform(km, (B, S, S)) > 0.4).astype(jnp.float32)
    adj = jnp.maximum(adj, jnp.eye(S, dtype=jnp.float32)[None])

    for pre_lnorm in (False, True):
        for use_adj in (False, True):
            mask = adj if use_adj else mask2d
            out = encoder_layer_forward(params, src, rec_src, mask,
                                        use_adj_mask=use_adj,
                                        pre_lnorm=pre_lnorm)
            jax.block_until_ready(out)
            ref = encoder_layer_reference(params, src, rec_src, mask,
                                          use_adj_mask=use_adj,
                                          pre_lnorm=pre_lnorm)
            np.testing.assert_allclose(np.asarray(out), np.asarray(ref),
                                       rtol=1e-4, atol=1e-5)

    print("KERNEL_OK")
</pallas_src>

<mosaic_0001>
module attributes {stable_mosaic.version = 11 : i64} {
  func.func @_encoder_layer_kernel(%arg0: i32, %arg1: memref<1x8x32xf32, #tpu.memory_space<vmem>>, %arg2: memref<1x8x32xf32, #tpu.memory_space<vmem>>, %arg3: memref<1x8x8xf32, #tpu.memory_space<vmem>>, %arg4: memref<32x32xf32, #tpu.memory_space<vmem>>, %arg5: memref<32x32xf32, #tpu.memory_space<vmem>>, %arg6: memref<32x32xf32, #tpu.memory_space<vmem>>, %arg7: memref<32x32xf32, #tpu.memory_space<vmem>>, %arg8: memref<1x32xf32, #tpu.memory_space<vmem>>, %arg9: memref<32x64xf32, #tpu.memory_space<vmem>>, %arg10: memref<1x64xf32, #tpu.memory_space<vmem>>, %arg11: memref<64x32xf32, #tpu.memory_space<vmem>>, %arg12: memref<1x32xf32, #tpu.memory_space<vmem>>, %arg13: memref<1x32xf32, #tpu.memory_space<vmem>>, %arg14: memref<1x32xf32, #tpu.memory_space<vmem>>, %arg15: memref<1x32xf32, #tpu.memory_space<vmem>>, %arg16: memref<1x32xf32, #tpu.memory_space<vmem>>, %arg17: memref<1x8x32xf32, #tpu.memory_space<vmem>>) attributes {dimension_semantics = [#tpu.dimension_semantics<parallel>], iteration_bounds = array<i64: 2>, scalar_prefetch = 0 : i64, scratch_operands = 0 : i64, tpu.core_type = #tpu.core_type<tc>, window_params = [{transform_indices = @transform_0, window_bounds = array<i64: 1, 8, 32>}, {transform_indices = @transform_1, window_bounds = array<i64: 1, 8, 32>}, {transform_indices = @transform_2, window_bounds = array<i64: 1, 8, 8>}, {pipeline_mode = #tpu.pipeline_mode<synchronous>, transform_indices = @transform_3, window_bounds = array<i64: 32, 32>}, {pipeline_mode = #tpu.pipeline_mode<synchronous>, transform_indices = @transform_4, window_bounds = array<i64: 32, 32>}, {pipeline_mode = #tpu.pipeline_mode<synchronous>, transform_indices = @transform_5, window_bounds = array<i64: 32, 32>}, {pipeline_mode = #tpu.pipeline_mode<synchronous>, transform_indices = @transform_6, window_bounds = array<i64: 32, 32>}, {pipeline_mode = #tpu.pipeline_mode<synchronous>, transform_indices = @transform_7, window_bounds = array<i64: 1, 32>}, {pipeline_mode = #tpu.pipeline_mode<synchronous>, transform_indices = @transform_8, window_bounds = array<i64: 32, 64>}, {pipeline_mode = #tpu.pipeline_mode<synchronous>, transform_indices = @transform_9, window_bounds = array<i64: 1, 64>}, {pipeline_mode = #tpu.pipeline_mode<synchronous>, transform_indices = @transform_10, window_bounds = array<i64: 64, 32>}, {pipeline_mode = #tpu.pipeline_mode<synchronous>, transform_indices = @transform_11, window_bounds = array<i64: 1, 32>}, {pipeline_mode = #tpu.pipeline_mode<synchronous>, transform_indices = @transform_12, window_bounds = array<i64: 1, 32>}, {pipeline_mode = #tpu.pipeline_mode<synchronous>, transform_indices = @transform_13, window_bounds = array<i64: 1, 32>}, {pipeline_mode = #tpu.pipeline_mode<synchronous>, transform_indices = @transform_14, window_bounds = array<i64: 1, 32>}, {pipeline_mode = #tpu.pipeline_mode<synchronous>, transform_indices = @transform_15, window_bounds = array<i64: 1, 32>}, {transform_indices = @transform_16, window_bounds = array<i64: 1, 8, 32>}]} {
    %c0 = arith.constant 0 : index
    %c0_0 = arith.constant 0 : index
    %c0_1 = arith.constant 0 : index
    %0 = vector.load %arg1[%c0, %c0_0, %c0_1] : memref<1x8x32xf32, #tpu.memory_space<vmem>>, vector<1x8x32xf32>
    %1 = vector.shape_cast %0 : vector<1x8x32xf32> to vector<8x32xf32>
    %c0_2 = arith.constant 0 : index
    %c0_3 = arith.constant 0 : index
    %c0_4 = arith.constant 0 : index
    %2 = vector.load %arg2[%c0_2, %c0_3, %c0_4] : memref<1x8x32xf32, #tpu.memory_space<vmem>>, vector<1x8x32xf32>
    %3 = vector.shape_cast %2 : vector<1x8x32xf32> to vector<8x32xf32>
    %c0_5 = arith.constant 0 : index
    %c0_6 = arith.constant 0 : index
    %c0_7 = arith.constant 0 : index
    %4 = vector.load %arg3[%c0_5, %c0_6, %c0_7] : memref<1x8x8xf32, #tpu.memory_space<vmem>>, vector<1x8x8xf32>
    %5 = vector.shape_cast %4 : vector<1x8x8xf32> to vector<8x8xf32>
    %c0_8 = arith.constant 0 : index
    %c0_9 = arith.constant 0 : index
    %6 = vector.load %arg13[%c0_8, %c0_9] : memref<1x32xf32, #tpu.memory_space<vmem>>, vector<1x32xf32>
    %c0_10 = arith.constant 0 : index
    %c0_11 = arith.constant 0 : index
    %7 = vector.load %arg14[%c0_10, %c0_11] : memref<1x32xf32, #tpu.memory_space<vmem>>, vector<1x32xf32>
    %c0_12 = arith.constant 0 : index
    %c0_13 = arith.constant 0 : index
    %8 = vector.load %arg15[%c0_12, %c0_13] : memref<1x32xf32, #tpu.memory_space<vmem>>, vector<1x32xf32>
    %c0_14 = arith.constant 0 : index
    %c0_15 = arith.constant 0 : index
    %9 = vector.load %arg16[%c0_14, %c0_15] : memref<1x32xf32, #tpu.memory_space<vmem>>, vector<1x32xf32>
    %c0_16 = arith.constant 0 : index
    %c0_17 = arith.constant 0 : index
    %10 = vector.load %arg4[%c0_16, %c0_17] : memref<32x32xf32, #tpu.memory_space<vmem>>, vector<32x32xf32>
    %cst = arith.constant dense<0.000000e+00> : vector<8x32xf32>
    %11 = tpu.matmul %1, %10, %cst {dimension_numbers = #tpu.dot_dimension_numbers<[1], [0], [0], [1], [0, 0, 1, 1], [], []>} : vector<8x32xf32>, vector<32x32xf32>, vector<8x32xf32> -> vector<8x32xf32>
    %c0_18 = arith.constant 0 : index
    %c0_19 = arith.constant 0 : index
    %12 = vector.load %arg5[%c0_18, %c0_19] : memref<32x32xf32, #tpu.memory_space<vmem>>, vector<32x32xf32>
    %cst_20 = arith.constant dense<0.000000e+00> : vector<8x32xf32>
    %13 = tpu.matmul %3, %12, %cst_20 {dimension_numbers = #tpu.dot_dimension_numbers<[1], [0], [0], [1], [0, 0, 1, 1], [], []>} : vector<8x32xf32>, vector<32x32xf32>, vector<8x32xf32> -> vector<8x32xf32>
    %c0_21 = arith.constant 0 : index
    %c0_22 = arith.constant 0 : index
    %14 = vector.load %arg6[%c0_21, %c0_22] : memref<32x32xf32, #tpu.memory_space<vmem>>, vector<32x32xf32>
    %cst_23 = arith.constant dense<0.000000e+00> : vector<8x32xf32>
    %15 = tpu.matmul %1, %14, %cst_23 {dimension_numbers = #tpu.dot_dimension_numbers<[1], [0], [0], [1], [0, 0, 1, 1], [], []>} : vector<8x32xf32>, vector<32x32xf32>, vector<8x32xf32> -> vector<8x32xf32>
    %16 = vector.extract_strided_slice %11 {offsets = [0, 0], sizes = [8, 8], strides = [1, 1]} : vector<8x32xf32> to vector<8x8xf32>
    %17 = vector.extract_strided_slice %13 {offsets = [0, 0], sizes = [8, 8], strides = [1, 1]} : vector<8x32xf32> to vector<8x8xf32>
    %18 = vector.extract_strided_slice %15 {offsets = [0, 0], sizes = [8, 8], strides = [1, 1]} : vector<8x32xf32> to vector<8x8xf32>
    %cst_24 = arith.constant dense<0.000000e+00> : vector<8x8xf32>
    %19 = tpu.matmul %16, %17, %cst_24 {dimension_numbers = #tpu.dot_dimension_numbers<[1], [1], [0], [0], [0, 0, 1, 0], [], []>} : vector<8x8xf32>, vector<8x8xf32>, vector<8x8xf32> -> vector<8x8xf32>
    %cst_25 = arith.constant 0.353553385 : f32
    %20 = vector.broadcast %cst_25 : f32 to vector<8x8xf32>
    %21 = arith.mulf %19, %20 : vector<8x8xf32>
    %cst_26 = arith.constant 0.000000e+00 : f32
    %22 = vector.broadcast %cst_26 : f32 to vector<8x8xf32>
    %23 = arith.cmpf ogt, %5, %22 : vector<8x8xf32>
    %cst_27 = arith.constant -1.000000e+32 : f32
    %24 = vector.broadcast %cst_27 : f32 to vector<8x8xf32>
    %25 = arith.select %23, %21, %24 : vector<8x8xi1>, vector<8x8xf32>
    %cst_28 = arith.constant dense<0xFF800000> : vector<8xf32>
    %26 = vector.multi_reduction <maximumf>, %25, %cst_28 [1] : vector<8x8xf32> to vector<8xf32>
    %27 = vector.shape_cast %26 : vector<8xf32> to vector<8x1xf32>
    %28 = vector.broadcast %27 : vector<8x1xf32> to vector<8x8xf32>
    %29 = arith.subf %25, %28 : vector<8x8xf32>
    %30 = math.exp %29 : vector<8x8xf32>
    %cst_29 = arith.constant dense<0.000000e+00> : vector<8xf32>
    %31 = vector.multi_reduction <add>, %30, %cst_29 [1] : vector<8x8xf32> to vector<8xf32>
    %32 = vector.shape_cast %31 : vector<8xf32> to vector<8x1xf32>
    %33 = vector.broadcast %32 : vector<8x1xf32> to vector<8x8xf32>
    %34 = arith.divf %30, %33 : vector<8x8xf32>
    %cst_30 = arith.constant dense<0.000000e+00> : vector<8x8xf32>
    %35 = tpu.matmul %34, %18, %cst_30 {dimension_numbers = #tpu.dot_dimension_numbers<[1], [0], [0], [1], [0, 0, 1, 1], [], []>} : vector<8x8xf32>, vector<8x8xf32>, vector<8x8xf32> -> vector<8x8xf32>
    %36 = vector.extract_strided_slice %11 {offsets = [0, 8], sizes = [8, 8], strides = [1, 1]} : vector<8x32xf32> to vector<8x8xf32>
    %37 = vector.extract_strided_slice %13 {offsets = [0, 8], sizes = [8, 8], strides = [1, 1]} : vector<8x32xf32> to vector<8x8xf32>
    %38 = vector.extract_strided_slice %15 {offsets = [0, 8], sizes = [8, 8], strides = [1, 1]} : vector<8x32xf32> to vector<8x8xf32>
    %cst_31 = arith.constant dense<0.000000e+00> : vector<8x8xf32>
    %39 = tpu.matmul %36, %37, %cst_31 {dimension_numbers = #tpu.dot_dimension_numbers<[1], [1], [0], [0], [0, 0, 1, 0], [], []>} : vector<8x8xf32>, vector<8x8xf32>, vector<8x8xf32> -> vector<8x8xf32>
    %cst_32 = arith.constant 0.353553385 : f32
    %40 = vector.broadcast %cst_32 : f32 to vector<8x8xf32>
    %41 = arith.mulf %39, %40 : vector<8x8xf32>
    %cst_33 = arith.constant 0.000000e+00 : f32
    %42 = vector.broadcast %cst_33 : f32 to vector<8x8xf32>
    %43 = arith.cmpf ogt, %5, %42 : vector<8x8xf32>
    %cst_34 = arith.constant -1.000000e+32 : f32
    %44 = vector.broadcast %cst_34 : f32 to vector<8x8xf32>
    %45 = arith.select %43, %41, %44 : vector<8x8xi1>, vector<8x8xf32>
    %cst_35 = arith.constant dense<0xFF800000> : vector<8xf32>
    %46 = vector.multi_reduction <maximumf>, %45, %cst_35 [1] : vector<8x8xf32> to vector<8xf32>
    %47 = vector.shape_cast %46 : vector<8xf32> to vector<8x1xf32>
    %48 = vector.broadcast %47 : vector<8x1xf32> to vector<8x8xf32>
    %49 = arith.subf %45, %48 : vector<8x8xf32>
    %50 = math.exp %49 : vector<8x8xf32>
    %cst_36 = arith.constant dense<0.000000e+00> : vector<8xf32>
    %51 = vector.multi_reduction <add>, %50, %cst_36 [1] : vector<8x8xf32> to vector<8xf32>
    %52 = vector.shape_cast %51 : vector<8xf32> to vector<8x1xf32>
    %53 = vector.broadcast %52 : vector<8x1xf32> to vector<8x8xf32>
    %54 = arith.divf %50, %53 : vector<8x8xf32>
    %cst_37 = arith.constant dense<0.000000e+00> : vector<8x8xf32>
    %55 = tpu.matmul %54, %38, %cst_37 {dimension_numbers = #tpu.dot_dimension_numbers<[1], [0], [0], [1], [0, 0, 1, 1], [], []>} : vector<8x8xf32>, vector<8x8xf32>, vector<8x8xf32> -> vector<8x8xf32>
    %56 = vector.extract_strided_slice %11 {offsets = [0, 16], sizes = [8, 8], strides = [1, 1]} : vector<8x32xf32> to vector<8x8xf32>
    %57 = vector.extract_strided_slice %13 {offsets = [0, 16], sizes = [8, 8], strides = [1, 1]} : vector<8x32xf32> to vector<8x8xf32>
    %58 = vector.extract_strided_slice %15 {offsets = [0, 16], sizes = [8, 8], strides = [1, 1]} : vector<8x32xf32> to vector<8x8xf32>
    %cst_38 = arith.constant dense<0.000000e+00> : vector<8x8xf32>
    %59 = tpu.matmul %56, %57, %cst_38 {dimension_numbers = #tpu.dot_dimension_numbers<[1], [1], [0], [0], [0, 0, 1, 0], [], []>} : vector<8x8xf32>, vector<8x8xf32>, vector<8x8xf32> -> vector<8x8xf32>
    %cst_39 = arith.constant 0.353553385 : f32
    %60 = vector.broadcast %cst_39 : f32 to vector<8x8xf32>
    %61 = arith.mulf %59, %60 : vector<8x8xf32>
    %cst_40 = arith.constant 0.000000e+00 : f32
    %62 = vector.broadcast %cst_40 : f32 to vector<8x8xf32>
    %63 = arith.cmpf ogt, %5, %62 : vector<8x8xf32>
    %cst_41 = arith.constant -1.000000e+32 : f32
    %64 = vector.broadcast %cst_41 : f32 to vector<8x8xf32>
    %65 = arith.select %63, %61, %64 : vector<8x8xi1>, vector<8x8xf32>
    %cst_42 = arith.constant dense<0xFF800000> : vector<8xf32>
    %66 = vector.multi_reduction <maximumf>, %65, %cst_42 [1] : vector<8x8xf32> to vector<8xf32>
    %67 = vector.shape_cast %66 : vector<8xf32> to vector<8x1xf32>
    %68 = vector.broadcast %67 : vector<8x1xf32> to vector<8x8xf32>
    %69 = arith.subf %65, %68 : vector<8x8xf32>
    %70 = math.exp %69 : vector<8x8xf32>
    %cst_43 = arith.constant dense<0.000000e+00> : vector<8xf32>
    %71 = vector.multi_reduction <add>, %70, %cst_43 [1] : vector<8x8xf32> to vector<8xf32>
    %72 = vector.shape_cast %71 : vector<8xf32> to vector<8x1xf32>
    %73 = vector.broadcast %72 : vector<8x1xf32> to vector<8x8xf32>
    %74 = arith.divf %70, %73 : vector<8x8xf32>
    %cst_44 = arith.constant dense<0.000000e+00> : vector<8x8xf32>
    %75 = tpu.matmul %74, %58, %cst_44 {dimension_numbers = #tpu.dot_dimension_numbers<[1], [0], [0], [1], [0, 0, 1, 1], [], []>} : vector<8x8xf32>, vector<8x8xf32>, vector<8x8xf32> -> vector<8x8xf32>
    %76 = vector.extract_strided_slice %11 {offsets = [0, 24], sizes = [8, 8], strides = [1, 1]} : vector<8x32xf32> to vector<8x8xf32>
    %77 = vector.extract_strided_slice %13 {offsets = [0, 24], sizes = [8, 8], strides = [1, 1]} : vector<8x32xf32> to vector<8x8xf32>
    %78 = vector.extract_strided_slice %15 {offsets = [0, 24], sizes = [8, 8], strides = [1, 1]} : vector<8x32xf32> to vector<8x8xf32>
    %cst_45 = arith.constant dense<0.000000e+00> : vector<8x8xf32>
    %79 = tpu.matmul %76, %77, %cst_45 {dimension_numbers = #tpu.dot_dimension_numbers<[1], [1], [0], [0], [0, 0, 1, 0], [], []>} : vector<8x8xf32>, vector<8x8xf32>, vector<8x8xf32> -> vector<8x8xf32>
    %cst_46 = arith.constant 0.353553385 : f32
    %80 = vector.broadcast %cst_46 : f32 to vector<8x8xf32>
    %81 = arith.mulf %79, %80 : vector<8x8xf32>
    %cst_47 = arith.constant 0.000000e+00 : f32
    %82 = vector.broadcast %cst_47 : f32 to vector<8x8xf32>
    %83 = arith.cmpf ogt, %5, %82 : vector<8x8xf32>
    %cst_48 = arith.constant -1.000000e+32 : f32
    %84 = vector.broadcast %cst_48 : f32 to vector<8x8xf32>
    %85 = arith.select %83, %81, %84 : vector<8x8xi1>, vector<8x8xf32>
    %cst_49 = arith.constant dense<0xFF800000> : vector<8xf32>
    %86 = vector.multi_reduction <maximumf>, %85, %cst_49 [1] : vector<8x8xf32> to vector<8xf32>
    %87 = vector.shape_cast %86 : vector<8xf32> to vector<8x1xf32>
    %88 = vector.broadcast %87 : vector<8x1xf32> to vector<8x8xf32>
    %89 = arith.subf %85, %88 : vector<8x8xf32>
    %90 = math.exp %89 : vector<8x8xf32>
    %cst_50 = arith.constant dense<0.000000e+00> : vector<8xf32>
    %91 = vector.multi_reduction <add>, %90, %cst_50 [1] : vector<8x8xf32> to vector<8xf32>
    %92 = vector.shape_cast %91 : vector<8xf32> to vector<8x1xf32>
    %93 = vector.broadcast %92 : vector<8x1xf32> to vector<8x8xf32>
    %94 = arith.divf %90, %93 : vector<8x8xf32>
    %cst_51 = arith.constant dense<0.000000e+00> : vector<8x8xf32>
    %95 = tpu.matmul %94, %78, %cst_51 {dimension_numbers = #tpu.dot_dimension_numbers<[1], [0], [0], [1], [0, 0, 1, 1], [], []>} : vector<8x8xf32>, vector<8x8xf32>, vector<8x8xf32> -> vector<8x8xf32>
    %96 = tpu.concatenate %35, %55, %75, %95 in 1 : vector<8x8xf32>, vector<8x8xf32>, vector<8x8xf32>, vector<8x8xf32> -> vector<8x32xf32>
    %c0_52 = arith.constant 0 : index
    %c0_53 = arith.constant 0 : index
    %97 = vector.load %arg7[%c0_52, %c0_53] : memref<32x32xf32, #tpu.memory_space<vmem>>, vector<32x32xf32>
    %cst_54 = arith.constant dense<0.000000e+00> : vector<8x32xf32>
    %98 = tpu.matmul %96, %97, %cst_54 {dimension_numbers = #tpu.dot_dimension_numbers<[1], [0], [0], [1], [0, 0, 1, 1], [], []>} : vector<8x32xf32>, vector<32x32xf32>, vector<8x32xf32> -> vector<8x32xf32>
    %c0_55 = arith.constant 0 : index
    %c0_56 = arith.constant 0 : index
    %99 = vector.load %arg8[%c0_55, %c0_56] : memref<1x32xf32, #tpu.memory_space<vmem>>, vector<1x32xf32>
    %100 = vector.broadcast %99 : vector<1x32xf32> to vector<8x32xf32>
    %101 = arith.addf %98, %100 : vector<8x32xf32>
    %102 = arith.addf %1, %101 : vector<8x32xf32>
    %cst_57 = arith.constant dense<0.000000e+00> : vector<8xf32>
    %103 = vector.multi_reduction <add>, %102, %cst_57 [1] : vector<8x32xf32> to vector<8xf32>
    %104 = vector.shape_cast %103 : vector<8xf32> to vector<8x1xf32>
    %cst_58 = arith.constant 3.200000e+01 : f32
    %105 = vector.broadcast %cst_58 : f32 to vector<8x1xf32>
    %106 = arith.divf %104, %105 : vector<8x1xf32>
    %107 = vector.broadcast %106 : vector<8x1xf32> to vector<8x32xf32>
    %108 = arith.subf %102, %107 : vector<8x32xf32>
    %109 = arith.mulf %108, %108 : vector<8x32xf32>
    %cst_59 = arith.constant dense<0.000000e+00> : vector<8xf32>
    %110 = vector.multi_reduction <add>, %109, %cst_59 [1] : vector<8x32xf32> to vector<8xf32>
    %111 = vector.shape_cast %110 : vector<8xf32> to vector<8x1xf32>
    %cst_60 = arith.constant 3.200000e+01 : f32
    %112 = vector.broadcast %cst_60 : f32 to vector<8x1xf32>
    %113 = arith.divf %111, %112 : vector<8x1xf32>
    %cst_61 = arith.constant 9.99999974E-6 : f32
    %114 = vector.broadcast %cst_61 : f32 to vector<8x1xf32>
    %115 = arith.addf %113, %114 : vector<8x1xf32>
    %116 = math.sqrt %115 : vector<8x1xf32>
    %117 = vector.broadcast %116 : vector<8x1xf32> to vector<8x32xf32>
    %118 = arith.divf %108, %117 : vector<8x32xf32>
    %119 = vector.broadcast %6 : vector<1x32xf32> to vector<8x32xf32>
    %120 = arith.mulf %118, %119 : vector<8x32xf32>
    %121 = vector.broadcast %7 : vector<1x32xf32> to vector<8x32xf32>
    %122 = arith.addf %120, %121 : vector<8x32xf32>
    %c0_62 = arith.constant 0 : index
    %c0_63 = arith.constant 0 : index
    %123 = vector.load %arg9[%c0_62, %c0_63] : memref<32x64xf32, #tpu.memory_space<vmem>>, vector<32x64xf32>
    %cst_64 = arith.constant dense<0.000000e+00> : vector<8x64xf32>
    %124 = tpu.matmul %122, %123, %cst_64 {dimension_numbers = #tpu.dot_dimension_numbers<[1], [0], [0], [1], [0, 0, 1, 1], [], []>} : vector<8x32xf32>, vector<32x64xf32>, vector<8x64xf32> -> vector<8x64xf32>
    %c0_65 = arith.constant 0 : index
    %c0_66 = arith.constant 0 : index
    %125 = vector.load %arg10[%c0_65, %c0_66] : memref<1x64xf32, #tpu.memory_space<vmem>>, vector<1x64xf32>
    %126 = vector.broadcast %125 : vector<1x64xf32> to vector<8x64xf32>
    %127 = arith.addf %124, %126 : vector<8x64xf32>
    %cst_67 = arith.constant 0.000000e+00 : f32
    %128 = vector.broadcast %cst_67 : f32 to vector<8x64xf32>
    %129 = arith.maximumf %127, %128 : vector<8x64xf32>
    %c0_68 = arith.constant 0 : index
    %c0_69 = arith.constant 0 : index
    %130 = vector.load %arg11[%c0_68, %c0_69] : memref<64x32xf32, #tpu.memory_space<vmem>>, vector<64x32xf32>
    %cst_70 = arith.constant dense<0.000000e+00> : vector<8x32xf32>
    %131 = tpu.matmul %129, %130, %cst_70 {dimension_numbers = #tpu.dot_dimension_numbers<[1], [0], [0], [1], [0, 0, 1, 1], [], []>} : vector<8x64xf32>, vector<64x32xf32>, vector<8x32xf32> -> vector<8x32xf32>
    %c0_71 = arith.constant 0 : index
    %c0_72 = arith.constant 0 : index
    %132 = vector.load %arg12[%c0_71, %c0_72] : memref<1x32xf32, #tpu.memory_space<vmem>>, vector<1x32xf32>
    %133 = vector.broadcast %132 : vector<1x32xf32> to vector<8x32xf32>
    %134 = arith.addf %131, %133 : vector<8x32xf32>
    %135 = arith.addf %122, %134 : vector<8x32xf32>
    %cst_73 = arith.constant dense<0.000000e+00> : vector<8xf32>
    %136 = vector.multi_reduction <add>, %135, %cst_73 [1] : vector<8x32xf32> to vector<8xf32>
    %137 = vector.shape_cast %136 : vector<8xf32> to vector<8x1xf32>
    %cst_74 = arith.constant 3.200000e+01 : f32
    %138 = vector.broadcast %cst_74 : f32 to vector<8x1xf32>
    %139 = arith.divf %137, %138 : vector<8x1xf32>
    %140 = vector.broadcast %139 : vector<8x1xf32> to vector<8x32xf32>
    %141 = arith.subf %135, %140 : vector<8x32xf32>
    %142 = arith.mulf %141, %141 : vector<8x32xf32>
    %cst_75 = arith.constant dense<0.000000e+00> : vector<8xf32>
    %143 = vector.multi_reduction <add>, %142, %cst_75 [1] : vector<8x32xf32> to vector<8xf32>
    %144 = vector.shape_cast %143 : vector<8xf32> to vector<8x1xf32>
    %cst_76 = arith.constant 3.200000e+01 : f32
    %145 = vector.broadcast %cst_76 : f32 to vector<8x1xf32>
    %146 = arith.divf %144, %145 : vector<8x1xf32>
    %cst_77 = arith.constant 9.99999974E-6 : f32
    %147 = vector.broadcast %cst_77 : f32 to vector<8x1xf32>
    %148 = arith.addf %146, %147 : vector<8x1xf32>
    %149 = math.sqrt %148 : vector<8x1xf32>
    %150 = vector.broadcast %149 : vector<8x1xf32> to vector<8x32xf32>
    %151 = arith.divf %141, %150 : vector<8x32xf32>
    %152 = vector.broadcast %8 : vector<1x32xf32> to vector<8x32xf32>
    %153 = arith.mulf %151, %152 : vector<8x32xf32>
    %154 = vector.broadcast %9 : vector<1x32xf32> to vector<8x32xf32>
    %155 = arith.addf %153, %154 : vector<8x32xf32>
    %c0_78 = arith.constant 0 : index
    %c0_79 = arith.constant 0 : index
    %c0_80 = arith.constant 0 : index
    %156 = vector.load %arg17[%c0_78, %c0_79, %c0_80] : memref<1x8x32xf32, #tpu.memory_space<vmem>>, vector<1x8x32xf32>
    %157 = vector.shape_cast %156 : vector<1x8x32xf32> to vector<8x32xf32>
    %158 = vector.shape_cast %155 : vector<8x32xf32> to vector<1x8x32xf32>
    tpu.vector_store %arg17[%c0_78, %c0_79, %c0_80], %158 {strides = array<i32>} : memref<1x8x32xf32, #tpu.memory_space<vmem>>, vector<1x8x32xf32>,
    return
  }
  func.func @transform_0(%arg0: i32) -> (i32, i32, i32) {
    %c0_i32 = arith.constant 0 : i32
    %c0_i32_0 = arith.constant 0 : i32
    %c0_i32_1 = arith.constant 0 : i32
    return %arg0, %c0_i32, %c0_i32_0 : i32, i32, i32
  }
  func.func @transform_1(%arg0: i32) -> (i32, i32, i32) {
    %c0_i32 = arith.constant 0 : i32
    %c0_i32_0 = arith.constant 0 : i32
    %c0_i32_1 = arith.constant 0 : i32
    return %arg0, %c0_i32, %c0_i32_0 : i32, i32, i32
  }
  func.func @transform_2(%arg0: i32) -> (i32, i32, i32) {
    %c0_i32 = arith.constant 0 : i32
    %c0_i32_0 = arith.constant 0 : i32
    %c0_i32_1 = arith.constant 0 : i32
    return %arg0, %c0_i32, %c0_i32_0 : i32, i32, i32
  }
  func.func @transform_3(%arg0: i32) -> (i32, i32) {
    %c0_i32 = arith.constant 0 : i32
    %c0_i32_0 = arith.constant 0 : i32
    %c0_i32_1 = arith.constant 0 : i32
    return %c0_i32, %c0_i32_0 : i32, i32
  }
  func.func @transform_4(%arg0: i32) -> (i32, i32) {
    %c0_i32 = arith.constant 0 : i32
    %c0_i32_0 = arith.constant 0 : i32
    %c0_i32_1 = arith.constant 0 : i32
    return %c0_i32, %c0_i32_0 : i32, i32
  }
  func.func @transform_5(%arg0: i32) -> (i32, i32) {
    %c0_i32 = arith.constant 0 : i32
    %c0_i32_0 = arith.constant 0 : i32
    %c0_i32_1 = arith.constant 0 : i32
    return %c0_i32, %c0_i32_0 : i32, i32
  }
  func.func @transform_6(%arg0: i32) -> (i32, i32) {
    %c0_i32 = arith.constant 0 : i32
    %c0_i32_0 = arith.constant 0 : i32
    %c0_i32_1 = arith.constant 0 : i32
    return %c0_i32, %c0_i32_0 : i32, i32
  }
  func.func @transform_7(%arg0: i32) -> (i32, i32) {
    %c0_i32 = arith.constant 0 : i32
    %c0_i32_0 = arith.constant 0 : i32
    %c0_i32_1 = arith.constant 0 : i32
    return %c0_i32, %c0_i32_0 : i32, i32
  }
  func.func @transform_8(%arg0: i32) -> (i32, i32) {
    %c0_i32 = arith.constant 0 : i32
    %c0_i32_0 = arith.constant 0 : i32
    %c0_i32_1 = arith.constant 0 : i32
    return %c0_i32, %c0_i32_0 : i32, i32
  }
  func.func @transform_9(%arg0: i32) -> (i32, i32) {
    %c0_i32 = arith.constant 0 : i32
    %c0_i32_0 = arith.constant 0 : i32
    %c0_i32_1 = arith.constant 0 : i32
    return %c0_i32, %c0_i32_0 : i32, i32
  }
  func.func @transform_10(%arg0: i32) -> (i32, i32) {
    %c0_i32 = arith.constant 0 : i32
    %c0_i32_0 = arith.constant 0 : i32
    %c0_i32_1 = arith.constant 0 : i32
    return %c0_i32, %c0_i32_0 : i32, i32
  }
  func.func @transform_11(%arg0: i32) -> (i32, i32) {
    %c0_i32 = arith.constant 0 : i32
    %c0_i32_0 = arith.constant 0 : i32
    %c0_i32_1 = arith.constant 0 : i32
    return %c0_i32, %c0_i32_0 : i32, i32
  }
  func.func @transform_12(%arg0: i32) -> (i32, i32) {
    %c0_i32 = arith.constant 0 : i32
    %c0_i32_0 = arith.constant 0 : i32
    %c0_i32_1 = arith.constant 0 : i32
    return %c0_i32, %c0_i32_0 : i32, i32
  }
  func.func @transform_13(%arg0: i32) -> (i32, i32) {
    %c0_i32 = arith.constant 0 : i32
    %c0_i32_0 = arith.constant 0 : i32
    %c0_i32_1 = arith.constant 0 : i32
    return %c0_i32, %c0_i32_0 : i32, i32
  }
  func.func @transform_14(%arg0: i32) -> (i32, i32) {
    %c0_i32 = arith.constant 0 : i32
    %c0_i32_0 = arith.constant 0 : i32
    %c0_i32_1 = arith.constant 0 : i32
    return %c0_i32, %c0_i32_0 : i32, i32
  }
  func.func @transform_15(%arg0: i32) -> (i32, i32) {
    %c0_i32 = arith.constant 0 : i32
    %c0_i32_0 = arith.constant 0 : i32
    %c0_i32_1 = arith.constant 0 : i32
    return %c0_i32, %c0_i32_0 : i32, i32
  }
  func.func @transform_16(%arg0: i32) -> (i32, i32, i32) {
    %c0_i32 = arith.constant 0 : i32
    %c0_i32_0 = arith.constant 0 : i32
    %c0_i32_1 = arith.constant 0 : i32
    return %arg0, %c0_i32, %c0_i32_0 : i32, i32, i32
  }
}

</mosaic_0001>

<bundles_post_ra>
// kernel: tpu_custom_call.1
= control target key start
LH: loop header
LB: loop body
LE: loop exit
PB: predicated region body
PF: predicated region fallthrough
CT: control target
= control target key end

     0   :  { %s3215_s0 = inlined_call_operand.hbm [shape: f32[2,8,32], index: 0, kind: input, shape index: {}]   ;;  %s3216_s1 = inlined_call_operand.hbm [shape: f32[2,8,32], index: 1, kind: input, shape index: {}]   ;;  %s3217_s2 = inlined_call_operand.hbm [shape: f32[2,8,8], index: 2, kind: input, shape index: {}]   ;;  %s3218_s3 = inlined_call_operand.vmem [shape: f32[32,32], index: 3, kind: input, shape index: {}]   ;;  %s3219_s4 = inlined_call_operand.vmem [shape: f32[32,32], index: 4, kind: input, shape index: {}]   ;;  %s3220_s5 = inlined_call_operand.vmem [shape: f32[32,32], index: 5, kind: input, shape index: {}]   ;;  %s3221_s6 = inlined_call_operand.hbm [shape: f32[32,32], index: 6, kind: input, shape index: {}]   ;;  %s3222_s7 = inlined_call_operand.vmem [shape: f32[1,32], index: 7, kind: input, shape index: {}]   ;;  %s3223_s8 = inlined_call_operand.hbm [shape: f32[32,64], index: 8, kind: input, shape index: {}]   ;;  %s3224_s9 = inlined_call_operand.vmem [shape: f32[1,64], index: 9, kind: input, shape index: {}]   ;;  %s3225_s10 = inlined_call_operand.vmem [shape: f32[64,32], index: 10, kind: input, shape index: {}]   ;;  %s3226_s11 = inlined_call_operand.vmem [shape: f32[1,32], index: 11, kind: input, shape index: {}]   ;;  %s3227_s12 = inlined_call_operand.vmem [shape: f32[1,32], index: 12, kind: input, shape index: {}]   ;;  %s3228_s13 = inlined_call_operand.vmem [shape: f32[1,32], index: 13, kind: input, shape index: {}]   ;;  %s3229_s14 = inlined_call_operand.vmem [shape: f32[1,32], index: 14, kind: input, shape index: {}]   ;;  %s3230_s15 = inlined_call_operand.vmem [shape: f32[1,32], index: 15, kind: input, shape index: {}]   ;;  %s3231_s16 = inlined_call_operand.hbm [shape: f32[2,8,32], index: 16, kind: output, shape index: {}]  }
   0x1   :  { %3255 = sst [smem:[#allocation22_spill]] %s3215_s0 }
   0x2   :  { %3256 = sst [smem:[#allocation23_spill]] %s3216_s1 }
   0x3   :  { %3257 = sst [smem:[#allocation24_spill]] %s3221_s6 }
   0x4   :  { %3258 = sst [smem:[#allocation25_spill]] %s3224_s9 }
   0x5   :  { %3259 = sst [smem:[#allocation26_spill]] %s3226_s11 }
   0x6   :  { %3260 = sst [smem:[#allocation27_spill]] %s3228_s13 }
   0x7   :  { %3261 = sst [smem:[#allocation28_spill]] %s3229_s14 }
   0x8   :  { %3262 = sst [smem:[#allocation29_spill]] %s3230_s15 }
   0x9   :  { %3263 = sst [smem:[#allocation30_spill]] %s3231_s16 }
   0xa   :  { %21 = vsyncpa [#allocation3], 0 }
   0xb   :  { %23 = vsyncpa [#allocation3 + $0x1], 0 }
   0xc   :  { %24 = vsyncpa [#allocation6], 0 }
   0xd   :  { %26 = vsyncpa [#allocation6 + $0x1], 0 }
   0xe   :  { %27 = vsyncpa [#allocation9], 0 }
   0xf   :  { %28 = vsyncpa [#allocation4], 0 }
  0x10   :  { %30 = vsyncpa [#allocation4 + $0x1], 0  ;;  %s2721_s21 = smov 0   ;;  %s2723_s22 = smov 0  }
  0x11   :  { %s2725_s23 = smov 0   ;;  %s2727_s24 = smov 0  }
  0x12 LB: > { %3264 = sst [smem:[#allocation16_spill]] %s2605_s21  ;;  %s2742_s25 = sadd.s32 4294967295, %s2617_s24   ;;  %s2617_s24 = sphi %s2727_s24, %s3307_s24   ;;  %s2613_s23 = sphi %s2725_s23, %s3311_s23   ;;  %s2609_s22 = sphi %s2723_s22, %s3310_s22   ;;  %s2605_s21 = sphi %s2721_s21, %s3309_s21  }
  0x13   : > { %3265 = sst [smem:[#allocation17_spill]] %s2617_s24  ;;  %s2032_s26 = sadd.s32 4294967294, %s2617_s24  }
  0x14   : > { %p56_p0 = scmp.ne.s32.totalorder %s2609_s22, %s2605_s21  ;;  %p3236_p1 = scmp.eq.s32.totalorder %s2742_s25, 0 }
  0x15   : > { %p411_p3 = scmp.eq.s32.totalorder %s2032_s26, 1  ;;  %p2033_p5 = scmp.ge.s32.totalorder %s2617_s24, 1 }
  0x16   : > { %p2751_p4 = por %p3236_p1, %p56_p0  ;;  %p418_p7 = scmp.lt.s32.totalorder %s2617_s24, 3 }
  0x17   : > { %p2756_p6 = por %p411_p3, %p56_p0  ;;  %s2619_s30 = smov [#allocation8]  }
  0x18   : > { %s3266_s27 = scalar_select %p2751_p4, 1, 0 }
  0x19   : > { %s3267_s28 = scalar_select %p2756_p6, 1, 0 }
  0x1a   : > { %p2761_p8 = pnand %p2033_p5, %p418_p7  ;;  %s439_s0 = sshll.u32 %s2619_s30, 4  ;;  %s2765_s0 = int_to_ptr.vmem [resolvable:$true] %s439_s0 }
  0x1b   : > { %3268 = sst [smem:[#allocation18_spill]] %s3267_s28  ;;  %s2777_s18 = sadd.s32 1, %s2617_s24  }
  0x1c   : > { %s3269_s29 = scalar_select %p2761_p8, 1, 0 }
  0x1d   : > { %p2301_p9 = pneg %p2761_p8  ;;  %3271 = sst [smem:[#allocation19_spill]] %s2777_s18 }
  0x1e   : > { %s43_s19 = sadd.s32 1, %s2613_s23  ;;  %s40_s20 = ssub.s32 %s2617_s24, %s2777_s18 }
  0x1f   : > { %p2772_p11 = pnand %p2301_p9, %p3236_p1  ;;  %s3272_s6 = sld [smem:[#allocation24_spill]] }
  0x21   : > { %s3270_s17 = scalar_select %p2772_p11, 1, 0 }
  0x22   : > { %p3245_p13 = pneg %p2772_p11 }
  0x25   : > { %s2397_s30 = scalar_lea.hbm %s3272_s6, 512 }
  0x26   : > { %p2398_p12 = scmp.ne.s32.totalorder %s3272_s6, %s2397_s30  ;;  %p2404_p5 = scmp.lt.u32.totalorder %s2397_s30, %s3272_s6 }
  0x28   : > { %p2400_p0 = pnand %p3245_p13, %p2398_p12 }
  0x2a   : > { %p2401_p3 = pneg %p2400_p0 }
  0x2c   : > { %p2406_p7 = pnand %p2404_p5, %p2401_p3 }
  0x2e   : > { %2409 = shalt.err (!%p2406_p7)
}
  0x2f   : > { %s2410_s28 = scalar_lea.vmem %s2765_s0, 512  ;;  %p2418_p2 = scmp.lt.s32.totalorder %s2765_s0, %s2765_s0 }
  0x30   : > { %p2411_p9 = scmp.ne.s32.totalorder %s2765_s0, %s2410_s28  ;;  %p2419_p12 = scmp.lt.s32.totalorder %s2410_s28, %s2410_s28 }
  0x32   : > { %p2413_p10 = pnand %p2411_p9, %p3245_p13  ;;  %p2420_p0 = por %p2419_p12, %p2418_p2 }
  0x34   : > { %p2414_p1 = pneg %p2413_p10 }
  0x36   : > { %p2421_p6 = pnand %p2420_p0, %p2414_p1 }
  0x38   : > { %2424 = shalt.err (!%p2421_p6)
}
  0x39   : > { %s3239_s14 = smov 128   ;;  %s3240_s15 = smov 8  }
  0x3a   : > { %2304 = dma.hbm_to_vmem [thread:$0]  (!%p2772_p11), %s3272_s6, 512, %s2765_s0, [#allocation9], %s3239_s14, %s3239_s14, %s3240_s15  }
  0x3b   : > { %p41_p1 = scmp.eq.s32.totalorder %s40_s20, 0  ;;  %p50_p2 = scmp.ne.s32.totalorder %s2613_s23, %s2609_s22 }
  0x3c   : > { %p51_p6 = scmp.eq.s32.totalorder %s2617_s24, 0  ;;  %p2324_p10 = scmp.lt.s32.totalorder %s2617_s24, 2 }
  0x3d   : > { %s2817_s26 = scalar_select %p41_p1, %s2613_s23, %s43_s19  }
  0x3e   : > { %p52_p3 = por %p51_p6, %p50_p2  ;;  %p3274_p5 = scmp.eq.s32.totalorder %s2742_s25, 1 }
  0x3f   : > { %3273 = sst [smem:[#allocation20_spill]] %s2817_s26  ;;  %s3241_s28 = sand.u32 1, %s2613_s23  }
  0x40   : > { %p2821_p7 = por %p3274_p5, %p50_p2  ;;  %s2827_s18 = sshll.u32 %s2617_s24, 7 }
  0x41   : > { %s2831_s11 = sshll.u32 %s3241_s28, 3  ;;  %p2833_p9 = pnand %p2324_p10, %p52_p3 }
  0x42   : > { %s3275_s30 = scalar_select %p2821_p7, 1, 0 }
  0x43   : > { %s3277_s0 = scalar_select %p2833_p9, 1, 0 }
  0x44   : > { %3276 = sst [smem:[#allocation21_spill]] %s3275_s30  ;;  %s508_s19 = sand.u32 1, %s2617_s24  }
  0x45   : > { %s3278_s1 = sld [smem:[#allocation23_spill]]  ;;  %s512_s14 = scalar_lea.vmem [#allocation5], %s2831_s11 }
  0x46   : > { %s519_s15 = sshll.u32 %s512_s14, 4  ;;  %s2847_s28 = scalar_lea.sflag [#allocation6], %s508_s19  ;;  %s2845_s15 = int_to_ptr.vmem [resolvable:$true] %s519_s15 }
  0x47   : > { %p2853_p0 = pneg %p2833_p9 }
  0x49   : > { %s3279_s26 = scalar_select %p2853_p0, 1, 0 }
  0x4b   : > { %s2842_s21 = scalar_lea.hbm %s3278_s1, %s2827_s18  ;;  %s2430_s24 = scalar_lea.hbm %s3278_s1, 256 }
  0x4c   : > { %s2425_s6 = scalar_lea.hbm %s2842_s21, 128  ;;  %p2431_p6 = scmp.lt.u32.totalorder %s2842_s21, %s3278_s1 }
  0x4d   : > { %p2426_p12 = scmp.ne.s32.totalorder %s2842_s21, %s2425_s6  ;;  %p2432_p10 = scmp.lt.u32.totalorder %s2430_s24, %s2425_s6 }
  0x4e   : > { %p2434_p5 = scmp.lt.u32.totalorder %s2425_s6, %s2842_s21 }
  0x4f   : > { %p2428_p1 = pnand %p2853_p0, %p2426_p12  ;;  %p2433_p3 = por %p2432_p10, %p2431_p6 }
  0x51   : > { %p2429_p2 = pneg %p2428_p1  ;;  %p2435_p13 = por %p2434_p5, %p2433_p3 }
  0x53   : > { %p2436_p7 = pnand %p2435_p13, %p2429_p2 }
  0x55   : > { %2439 = shalt.err (!%p2436_p7)
}
  0x56   : > { %s2440_s19 = scalar_lea.vmem %s2845_s15, 128  ;;  %s2622_s20 = smov [#allocation5]  }
  0x57   : > { %p2441_p12 = scmp.ne.s32.totalorder %s2845_s15, %s2440_s19  ;;  %s2445_s16 = sshll.u32 %s2622_s20, 4  ;;  %s2446_s16 = int_to_ptr.vmem [resolvable:$false] %s2445_s16 }
  0x58   : > { %s2447_s30 = scalar_lea.vmem %s2446_s16, 256  ;;  %p2448_p8 = scmp.lt.s32.totalorder %s2845_s15, %s2446_s16 }
  0x59   : > { %p2443_p1 = pnand %p2441_p12, %p2853_p0  ;;  %p2449_p11 = scmp.lt.s32.totalorder %s2447_s30, %s2440_s19 }
  0x5b   : > { %p2444_p4 = pneg %p2443_p1  ;;  %p2450_p6 = por %p2449_p11, %p2448_p8 }
  0x5d   : > { %p2451_p10 = pnand %p2450_p6, %p2444_p4 }
  0x5f   : > { %2454 = shalt.err (!%p2451_p10)
}
  0x60   : > { %2314 = dma.hbm_to_vmem [thread:$0]  (!%p2833_p9), %s2842_s21, 128, %s2845_s15, %s2847_s28  }
  0x61   : > { %s2623_s6 = smov [#allocation10]   ;;  %s2455_s20 = scalar_lea.hbm %s3223_s8, 512 }
  0x62   : > { %s455_s24 = sshll.u32 %s2623_s6, 4  ;;  %p2456_p8 = scmp.ne.s32.totalorder %s3223_s8, %s2455_s20  ;;  %s456_s24 = int_to_ptr.vmem [resolvable:$true] %s455_s24 }
  0x63   : > { %p3280_p4 = scmp.ne.s32.totalorder %s3270_s17, 0  ;;  %p2462_p2 = scmp.lt.u32.totalorder %s2455_s20, %s3223_s8 }
  0x65   : > { %p3281_p11 = pneg %p3280_p4 }
  0x67   : > { %p2458_p13 = pnand %p2456_p8, %p3281_p11 }
  0x69   : > { %p2459_p7 = pneg %p2458_p13 }
  0x6b   : > { %p2464_p3 = pnand %p2462_p2, %p2459_p7 }
  0x6d   : > { %2467 = shalt.err (!%p2464_p3)
}
  0x6e   : > { %s2468_s15 = scalar_lea.vmem %s456_s24, 512  ;;  %p3282_p12 = pmov %p3281_p11 }
  0x6f   : > { %p2469_p5 = scmp.ne.s32.totalorder %s456_s24, %s2468_s15  ;;  %p2476_p10 = scmp.lt.s32.totalorder %s456_s24, %s456_s24 }
  0x70   : > { %p2477_p9 = scmp.lt.s32.totalorder %s2468_s15, %s2468_s15 }
  0x71   : > { %p2471_p1 = pnand %p2469_p5, %p3282_p12 }
  0x72   : > { %p2478_p0 = por %p2477_p9, %p2476_p10 }
  0x73   : > { %p2472_p6 = pneg %p2471_p1 }
  0x75   : > { %p2479_p8 = pnand %p2478_p0, %p2472_p6 }
  0x77   : > { %2482 = shalt.err (!%p2479_p8)
}
  0x78   : > { %s3283_s1 = smov 8   ;;  %s3284_s9 = smov 128  }
  0x79   : > { %2307 = dma.hbm_to_vmem [thread:$0]  (!%p3280_p4), %s3223_s8, 512, %s456_s24, [#allocation9], %s3284_s9, %s3284_s9, %s3283_s1  }
  0x7a   : > { %s3285_s16 = sld [smem:[#allocation22_spill]]  ;;  %s494_s17 = scalar_lea.vmem [#allocation2], %s2831_s11 }
  0x7b   : > { %s501_s30 = sshll.u32 %s494_s17, 4  ;;  %s3286_s15 = sand.u32 1, %s2613_s23   ;;  %s502_s30 = int_to_ptr.vmem [resolvable:$true] %s501_s30 }
  0x7c   : > { %s491_s13 = scalar_lea.sflag [#allocation3], %s3286_s15  ;;  %p3287_p0 = scmp.ne.s32.totalorder %s3279_s26, 0 }
  0x80   : > { %s2904_s19 = scalar_lea.hbm %s3285_s16, %s2827_s18  ;;  %s2488_s9 = scalar_lea.hbm %s3285_s16, 256 }
  0x81   : > { %s2483_s21 = scalar_lea.hbm %s2904_s19, 128  ;;  %p2489_p4 = scmp.lt.u32.totalorder %s2904_s19, %s3285_s16 }
  0x82   : > { %p2484_p9 = scmp.ne.s32.totalorder %s2904_s19, %s2483_s21  ;;  %p2490_p7 = scmp.lt.u32.totalorder %s2488_s9, %s2483_s21 }
  0x83   : > { %p2492_p3 = scmp.lt.u32.totalorder %s2483_s21, %s2904_s19 }
  0x84   : > { %p2486_p11 = pnand %p2484_p9, %p3287_p0  ;;  %p2491_p2 = por %p2490_p7, %p2489_p4 }
  0x86   : > { %p2487_p13 = pneg %p2486_p11  ;;  %p2493_p5 = por %p2492_p3, %p2491_p2 }
  0x88   : > { %p2494_p12 = pnand %p2493_p5, %p2487_p13 }
  0x8a   : > { %2497 = shalt.err (!%p2494_p12)
}
  0x8b   : > { %s2498_s20 = scalar_lea.vmem %s502_s30, 128  ;;  %s2624_s17 = smov [#allocation2]  }
  0x8c   : > { %p2499_p1 = scmp.ne.s32.totalorder %s502_s30, %s2498_s20  ;;  %s2503_s15 = sshll.u32 %s2624_s17, 4  ;;  %s2504_s15 = int_to_ptr.vmem [resolvable:$false] %s2503_s15 }
  0x8d   : > { %s2505_s24 = scalar_lea.vmem %s2504_s15, 256  ;;  %p2506_p8 = scmp.lt.s32.totalorder %s502_s30, %s2504_s15 }
  0x8e   : > { %p2501_p6 = pnand %p2499_p1, %p3287_p0  ;;  %p2507_p9 = scmp.lt.s32.totalorder %s2505_s24, %s2498_s20 }
  0x90   : > { %p2502_p10 = pneg %p2501_p6  ;;  %p2508_p11 = por %p2507_p9, %p2506_p8 }
  0x92   : > { %p2509_p4 = pnand %p2508_p11, %p2502_p10 }
  0x94   : > { %2512 = shalt.err (!%p2509_p4)
}
  0x95   : > { %p3288_p7 = scmp.ne.s32.totalorder %s3277_s0, 0  ;;  %s2930_s9 = scalar_lea.hbm %s3217_s2, %s2827_s18 }
  0x96   : > { %s530_s6 = scalar_lea.vmem [#allocation7], %s2831_s11  ;;  %s2513_s20 = scalar_lea.hbm %s2930_s9, 128 }
  0x97   : > { %2311 = dma.hbm_to_vmem [thread:$0]  (!%p3288_p7), %s2904_s19, 128, %s502_s30, %s491_s13  }
  0x98   : > { %s537_s14 = sshll.u32 %s530_s6, 4  ;;  %p2514_p13 = scmp.ne.s32.totalorder %s2930_s9, %s2513_s20  ;;  %s538_s14 = int_to_ptr.vmem [resolvable:$true] %s537_s14 }
  0x99   : > { %s2518_s13 = scalar_lea.hbm %s3217_s2, 256  ;;  %p2519_p5 = scmp.lt.u32.totalorder %s2930_s9, %s3217_s2 }
  0x9a   : > { %p2516_p2 = pnand %p2514_p13, %p3287_p0  ;;  %p2520_p12 = scmp.lt.u32.totalorder %s2518_s13, %s2513_s20 }
  0x9b   : > { %p2522_p6 = scmp.lt.u32.totalorder %s2513_s20, %s2930_s9 }
  0x9c   : > { %p2517_p3 = pneg %p2516_p2  ;;  %p2521_p1 = por %p2520_p12, %p2519_p5 }
  0x9e   : > { %p2523_p10 = por %p2522_p6, %p2521_p1 }
  0xa0   : > { %p2524_p8 = pnand %p2523_p10, %p2517_p3 }
  0xa2   : > { %2527 = shalt.err (!%p2524_p8)
}
  0xa3   : > { %s2528_s11 = scalar_lea.vmem %s538_s14, 128  ;;  %s2625_s18 = smov [#allocation7]  }
  0xa4   : > { %p2529_p9 = scmp.ne.s32.totalorder %s538_s14, %s2528_s11  ;;  %s2533_s24 = sshll.u32 %s2625_s18, 4  ;;  %s2534_s24 = int_to_ptr.vmem [resolvable:$false] %s2533_s24 }
  0xa5   : > { %s2535_s21 = scalar_lea.vmem %s2534_s24, 256  ;;  %p2536_p13 = scmp.lt.s32.totalorder %s538_s14, %s2534_s24 }
  0xa6   : > { %p2531_p11 = pnand %p2529_p9, %p3287_p0  ;;  %p2537_p2 = scmp.lt.s32.totalorder %s2535_s21, %s2528_s11 }
  0xa8   : > { %p2532_p4 = pneg %p2531_p11  ;;  %p2538_p7 = por %p2537_p2, %p2536_p13 }
  0xaa   : > { %p2539_p5 = pnand %p2538_p7, %p2532_p4 }
  0xac   : > { %2542 = shalt.err (!%p2539_p5)
}
  0xad   : > { %p3289_p12 = scmp.ne.s32.totalorder %s3277_s0, 0  ;;  %p3290_p3 = scmp.ne.s32.totalorder %s3269_s29, 0 }
  0xae   : > { %s2954_s26 = sand.u32 (!%p3290_p3), 1, %s2609_s22   ;;  %p3291_p0 = scmp.ne.s32.totalorder (!%p3290_p3), %s3266_s27, 0 }
  0xaf   : > { %2317 = dma.hbm_to_vmem [thread:$0]  (!%p3289_p12), %s2930_s9, 128, %s538_s14, %s2847_s28  }
  0xb0   : > { %546 = sbr.rel (%p3290_p3) target bundleno = 2723 (0xaa3), region = 84  ;;  %s2957_s1 = sshll.u32 (!%p3290_p3), %s2954_s26, 3 }
  0xb1   : > { %s549_s6 = scalar_lea.sflag (!%p3290_p3), [#allocation3], %s2954_s26  ;;  %s552_s20 = scalar_lea.vmem (!%p3290_p3), [#allocation2], %s2957_s1 }
  0xb7   : > { %2588 = dma.done.wait (%p3291_p0), %s549_s6, 128  }
  0xb8   : > { %2590 = vsyncadd (%p3291_p0), %s549_s6, 4294967168  ;;  %s557_s29 = sand.u32 1, %s2742_s25   ;;  %s561_s0 = scalar_lea.vmem [#allocation5], %s2957_s1 }
  0xb9   : > { %s558_s28 = scalar_lea.sflag [#allocation6], %s557_s29 }
  0xba   : > { %2592 = dma.done.wait (%p3291_p0), %s558_s28, 256  }
  0xbb   : > { %2594 = vsyncadd (%p3291_p0), %s558_s28, 4294967040  ;;  %s570_s9 = scalar_lea.vmem [#allocation7], %s2957_s1  ;;  %p3292_p7 = scmp.eq.s32.totalorder %s2742_s25, 0 }
  0xbd   : > { %2596 = dma.done.wait (%p3292_p7), [#allocation9], 1024   ;;  %p3293_p1 = pmov %p3292_p7 }
  0xbe   : > { %v2626_v0 = vmov 0.0|0.0   ;;  %vm2627_vm0 = vmmov 0   ;;  %v2628_v1 = vmov 0.0   ;;  %v644_v2 = vld [vmem:[%s3218_s3] sm:$0xff]  ;;  %v645_v3 = vld [vmem:[%s3218_s3 + $0x8] sm:$0xff]  ;;  %v646_v4 = vld [vmem:[%s3218_s3 + $0x10] sm:$0xff] }
  0xbf   : > { %2598 = vsyncadd (%p3293_p1), [#allocation9], 4294966272  ;;  %2243 = vmatprep.subr.bf16.mxu1 %v2626_v0  ;;  %2137 = vmatprep.mubr.msk.f32.mxu1 %vm2627_vm0, %v2628_v1  ;;  %v2244_v5 = vpack.c.bf16 %v645_v3, %v644_v2  ;;  %v647_v6 = vld [vmem:[%s3218_s3 + $0x18] sm:$0xff]  ;;  %v722_v8 = vld [vmem:[%s3219_s4] sm:$0xff]  ;;  %vm648_vm1 = vcmask 261120   ;;  %vm873_vm2 = vcmask 64512  }
  0xc0   : > { %2255 = vmatprep.subr.bf16.mxu0 %v2626_v0  ;;  %2159 = vmatprep.mubr.msk.f32.mxu0 %vm2627_vm0, %v2628_v1  ;;  %v2247_v7 = vpack.c.bf16 %v647_v6, %v646_v4  ;;  %v723_v9 = vld [vmem:[%s3219_s4 + $0x8] sm:$0xff]  ;;  %v724_v12 = vld [vmem:[%s3219_s4 + $0x10] sm:$0xff]  ;;  %v725_v13 = vld [vmem:[%s3219_s4 + $0x18] sm:$0xff]  ;;  %s2629_s18 = smov 112   ;;  %s2630_s24 = smov 120   ;;  %vm1552_vm4 = vcmask 130048  }
  0xc1   : > { %2245 = vmatpush3.bf16.msra.mxu1 %v2244_v5  ;;  %v3001_v10 = vld [vmem:[%s552_s20] sm:$0xff]  ;;  %v2250_v11 = vpack.c.bf16 %v723_v9, %v722_v8  ;;  %v2253_v14 = vpack.c.bf16 %v725_v13, %v724_v12  ;;  %v638_v15 = vld [vmem:[%s561_s0] sm:$0xff]  ;;  %s2631_s21 = smov 104   ;;  %s2633_s6 = smov 16   ;;  %vm1554_vm5 = vcmask 195584   ;;  %vm1776_vm8 = vcmask 523264  }
  0xc2   : > { %2246 = vmatprep.subr.bf16.mxu1 %v2626_v0  ;;  %v799_v16 = vld [vmem:[%s3220_s5] sm:$0xff]  ;;  %v800_v17 = vld [vmem:[%s3220_s5 + $0x8] sm:$0xff]  ;;  %v801_v18 = vld [vmem:[%s3220_s5 + $0x10] sm:$0xff]  ;;  %s2634_s29 = smov 24   ;;  %s3294_s27 = sld [smem:[#allocation27_spill]] }
  0xc3   : > { %v2256_v19 = vpack.c.bf16 %v800_v17, %v799_v16  ;;  %v802_v20 = vld [vmem:[%s3220_s5 + $0x18] sm:$0xff]  ;;  %v639_v34 = vld [vmem:[%s570_s9] sm:$0xff]  ;;  %s2632_s9 = smov 8   ;;  %s3295_s30 = sld [smem:[#allocation25_spill]] }
  0xc4   : > { %v2259_v21 = vpack.c.bf16 %v802_v20, %v801_v18  ;;  %vm951_vm3 = vcmp.gt.f32.partialorder %v639_v34, 0.0  ;;  %v1558_v34 = vld [vmem:[#allocation8 + $0x10] sm:$0xff]  ;;  %s2076_s14 = sshll.u32 %s2742_s25, 7  ;;  %s636_s20 = scalar_lea.vmem [#allocation11], %s2957_s1 }
  0xc5   : > { %2248 = vmatpush3.bf16.msra.mxu1 %v2247_v7  ;;  %2257 = vmatpush3.bf16.msra.mxu0 %v2256_v19  ;;  %s1900_s17 = sshll.u32 %s636_s20, 4  ;;  %s3300_s19 = sld [smem:[#allocation30_spill]]  ;;  %s3172_s17 = int_to_ptr.vmem [resolvable:$true] %s1900_s17 }
  0xc6   : > { %2249 = vmatprep.subr.bf16.mxu1 %v2626_v0  ;;  %2258 = vmatprep.subr.bf16.mxu0 %v2626_v0  ;;  %s1887_s0 = scalar_lea.sflag [#allocation4], %s2954_s26  ;;  %s2543_s11 = scalar_lea.vmem %s3172_s17, 128 }
  0xc7   : > { %p2544_p6 = scmp.ne.s32.totalorder %s3172_s17, %s2543_s11  ;;  %s2635_s25 = smov [#allocation11]  }
  0xc8   : > { %2138 = vmatmul.mubr.msk.f32.vlgmr.msra.gmra.mrb[0].mxu1 %vm648_vm1, %v3001_v10  ;;  %s2547_s1 = sshll.u32 %s2635_s25, 4  ;;  %s2548_s1 = int_to_ptr.vmem [resolvable:$false] %s2547_s1 }
  0xc9   : > { %2251 = vmatpush3.bf16.msra.mxu1 %v2250_v11  ;;  %2148 = vmatprep.mubr.msk.f32.mxu1 %vm2627_vm0, %v2628_v1  ;;  %p2550_p11 = scmp.lt.s32.totalorder %s3172_s17, %s2548_s1 }
  0xca   : > { %2252 = vmatprep.subr.bf16.mxu1 %v2626_v0  ;;  %2260 = vmatpush3.bf16.msra.mxu0 %v2259_v21 }
  0xcb   : > { %2172 = vmatprep.subr.mxu0 %v2628_v1 }
  0xcd   : > { %2254 = vmatpush3.bf16.msra.mxu1 %v2253_v14  ;;  %2160 = vmatmul.mubr.msk.f32.vlgmr.msra.gmra.mrb[0].mxu0 %vm648_vm1, %v3001_v10 }
  0xce   : > { %2162 = vmatprep.subr.mxu1 %v2628_v1  ;;  %2174 = vmatprep.mubr.msk.f32.mxu0 %vm2627_vm0, %v2628_v1 }
  0xd0   : > { %2149 = vmatmul.mubr.msk.f32.vlgmr.msra.gmra.mrb[2].mxu1 %vm648_vm1, %v638_v15 }
  0xd1   : > { %2164 = vmatprep.mubr.msk.f32.mxu1 %vm2627_vm0, %v2628_v1 }
 0x19b   : > { %v718_v22 = vpop.f32.mrb[0].mxu1 }
 0x19c   : > { %v2139_v23 = vpop.f32.mrb[1].mxu1 }
 0x1a0   : > { %v3050_v26 = vpop.f32.mrb[0].mxu0 }
 0x1a1   : > { %v2161_v27 = vpop.f32.mrb[1].mxu0 }
 0x1a3   : > { %v795_v24 = vpop.f32.mrb[2].mxu1 }
 0x1a4   : > { %1207 = vrot.lane.b32.xlu1 %v795_v24, %s2629_s18  ;;  %1039 = vrot.lane.b32.xlu0 %v795_v24, %s2630_s24  ;;  %v2150_v25 = vpop.f32.mrb[3].mxu1 }
 0x1a5   : > { %2163 = vmatpush3.xpose.msk.msra.mxu1 %vm873_vm2, %v795_v24 }
 0x1a6   : > { %2167 = vmatprep.subr.mxu1 %v2628_v1 }
 0x1a8   : > { %2165 = vmatmul.mubr.msk.f32.vlgmr.msra.gmra.mrb[4].mxu1 %vm873_vm2, %v718_v22  ;;  %1205 = vrot.lane.b32.xlu1 %v718_v22, %s2629_s18 }
 0x1a9   : > { %1037 = vrot.lane.b32.xlu0 %v718_v22, %s2630_s24  ;;  %2169 = vmatprep.mubr.msk.f32.mxu1 %vm2627_vm0, %v2628_v1 }
 0x1aa   : > { %2168 = vmatpush3.msra.mxu1 %v3050_v26 }
 0x1ab   : > { %2177 = vmatprep.subr.mxu1 %v2628_v1 }
 0x1ac   : > { %1372 = vrot.lane.b32.xlu1 %v718_v22, %s2631_s21 }
 0x1ad   : > { %1374 = vrot.lane.b32.xlu0 %v795_v24, %s2631_s21 }
 0x216   : > { %v1040_v28 = vpop.permute.xlu0 %1039  ;;  %v1208_v29 = vpop.permute.xlu1 %1207 }
 0x217   : > { %2173 = vmatpush3.xpose.msk.msra.mxu0 %vm873_vm2, %v1040_v28 }
 0x218   : > { %2182 = vmatprep.subr.mxu0 %v2628_v1 }
 0x21a   : > { %v1206_v31 = vpop.permute.xlu1 %1205 }
 0x21b   : > { %v1038_v30 = vpop.permute.xlu0 %1037 }
 0x21c   : > { %2175 = vmatmul.mubr.msk.f32.vlgmr.msra.gmra.mrb[2].mxu0 %vm873_vm2, %v1038_v30 }
 0x21d   : > { %2183 = vmatpush3.xpose.msk.msra.mxu0 %vm873_vm2, %v1208_v29  ;;  %2184 = vmatprep.mubr.msk.f32.mxu0 %vm2627_vm0, %v2628_v1 }
 0x21e   : > { %2192 = vmatprep.subr.mxu0 %v2628_v1  ;;  %v1373_v33 = vpop.permute.xlu1 %1372 }
 0x21f   : > { %v1375_v32 = vpop.permute.xlu0 %1374 }
 0x220   : > { %2185 = vmatmul.mubr.msk.f32.vlgmr.msra.gmra.mrb[4].mxu0 %vm873_vm2, %v1206_v31  ;;  %v1556_v31 = vld [vmem:[#allocation8] sm:$0xff] }
 0x221   : > { %2193 = vmatpush3.xpose.msk.msra.mxu0 %vm873_vm2, %v1375_v32  ;;  %2194 = vmatprep.mubr.msk.f32.mxu0 %vm2627_vm0, %v2628_v1  ;;  %v1557_v32 = vld [vmem:[#allocation8 + $0x8] sm:$0xff] }
 0x222   : > { %2261 = vmatprep.subr.bf16.mxu0 %v2626_v0 }
 0x224   : > { %2195 = vmatmul.mubr.msk.f32.vlgmr.msra.gmra.mrb[6].mxu0 %vm873_vm2, %v1373_v33  ;;  %v2262_v33 = vpack.c.bf16 %v1557_v32, %v1556_v31 }
 0x225   : > { %2210 = vmatprep.mubr.msk.f32.mxu0 %vm2627_vm0, %v2628_v1 }
 0x226   : > { %2263 = vmatpush3.bf16.msra.mxu0 %v2262_v33 }
 0x227   : > { %2264 = vmatprep.subr.bf16.mxu0 %v2626_v0 }
 0x27b   : > { %v946_v35 = vpop.f32.mrb[4].mxu1 }
 0x27c   : > { %v950_v36 = vmul.f32 0.35355338, %v946_v35  ;;  %v2166_v37 = vpop.f32.mrb[5].mxu1  ;;  %v1559_v35 = vld [vmem:[#allocation8 + $0x18] sm:$0xff] }
 0x27e   : > { %v952_v38 = vsel %vm951_vm3, %v950_v36, -1e+32  ;;  %v2265_v36 = vpack.c.bf16 %v1559_v35, %v1558_v34 }
 0x27f   : > { %v953_v39 = vsel %vm873_vm2, %v952_v38, -inf }
 0x280   : > { %954 = vmax.xlane.f32.xlu0 %v953_v39  ;;  %2266 = vmatpush3.bf16.msra.mxu0 %v2265_v36 }
 0x281   : > { %2273 = vmatprep.subr.bf16.mxu0 %v2626_v0 }
 0x2ef   : > { %v1111_v40 = vpop.f32.mrb[2].mxu0 }
 0x2f0   : > { %v1115_v41 = vmul.f32 0.35355338, %v1111_v40  ;;  %v2176_v42 = vpop.f32.mrb[3].mxu0 }
 0x2f2   : > { %v1116_v43 = vsel %vm951_vm3, %v1115_v41, -1e+32 }
 0x2f3   : > { %v1279_v44 = vpop.f32.mrb[4].mxu0  ;;  %v1117_v45 = vsel %vm873_vm2, %v1116_v43, -inf }
 0x2f4   : > { %v1283_v46 = vmul.f32 0.35355338, %v1279_v44  ;;  %1118 = vmax.xlane.f32.xlu1 %v1117_v45  ;;  %v2186_v47 = vpop.f32.mrb[5].mxu0 }
 0x2f6   : > { %v1284_v48 = vsel %vm951_vm3, %v1283_v46, -1e+32 }
 0x2f7   : > { %v1446_v49 = vpop.f32.mrb[6].mxu0  ;;  %v1285_v50 = vsel %vm873_vm2, %v1284_v48, -inf }
 0x2f8   : > { %v1450_v51 = vmul.f32 0.35355338, %v1446_v49  ;;  %v2196_v52 = vpop.f32.mrb[7].mxu0  ;;  %1286 = vmax.xlane.f32.xlu0 %v1285_v50  ;;  %v2065_v49 = vld [vmem:[%s3222_s7] ss:$0 sm:$0xff] }
 0x2fa   : > { %v1451_v53 = vsel %vm951_vm3, %v1450_v51, -1e+32 }
 0x2fb   : > { %v1452_v54 = vsel %vm873_vm2, %v1451_v53, -inf }
 0x2fc   : > { %1453 = vmax.xlane.f32.xlu0 %v1452_v54 }
 0x305   : > { %1129 = vrot.lane.b32.xlu1 %v3050_v26, %s2630_s24  ;;  %s3297_s24 = sld [smem:[#allocation21_spill]] }
 0x30b   : > { %p3301_p10 = scmp.ne.s32.totalorder %s3297_s24, 0 }
 0x30d   : > { %v955_v55 = vpop.xlane.xlu0 %954  ;;  %p2545_p8 = pnand %p2544_p6, %p3301_p10 }
 0x30e   : > { %v956_v56 = vsub.f32 %v952_v38, %v955_v55 }
 0x30f   : > { %p2546_p9 = pneg %p2545_p8 }
 0x310   : > { %v957_v57 = vmul.f32 1.442695, %v956_v56 }
 0x312   : > { %2373 = vpow2.f32 %v957_v57 }
 0x31c   : > { %v2374_v58 = vpop.eup %2373 }
 0x31d   : > { %v959_v59 = vsel %vm873_vm2, %v2374_v58, 0.0 }
 0x329   : > { %960 = vadd.xlane.f32.xlu1 %v959_v59 }
 0x381   : > { %v1119_v60 = vpop.xlane.xlu1 %1118 }
 0x382   : > { %v1120_v61 = vsub.f32 %v1116_v43, %v1119_v60  ;;  %v1677_v60 = vld [vmem:[#allocation10 + $0x8] sm:$0xff] }
 0x384   : > { %v1121_v62 = vmul.f32 1.442695, %v1120_v61  ;;  %v1678_v61 = vld [vmem:[#allocation10 + $0x10] sm:$0xff] }
 0x385   : > { %v1287_v63 = vpop.xlane.xlu0 %1286  ;;  %v1130_v14 = vpop.permute.xlu1 %1129 }
 0x386   : > { %2375 = vpow2.f32 %v1121_v62  ;;  %v1288_v2 = vsub.f32 %v1284_v48, %v1287_v63  ;;  %v1679_v63 = vld [vmem:[#allocation10 + $0x18] sm:$0xff] }
 0x388   : > { %v1289_v3 = vmul.f32 1.442695, %v1288_v2  ;;  %v2271_v2 = vpack.c.bf16 %v1679_v63, %v1678_v61 }
 0x389   : > { %v1454_v4 = vpop.xlane.xlu0 %1453 }
 0x38a   : > { %2377 = vpow2.f32 %v1289_v3  ;;  %v1455_v5 = vsub.f32 %v1451_v53, %v1454_v4  ;;  %v1762_v3 = vld [vmem:[%s3225_s10 + $0x8] sm:$0xff]  ;;  %v1763_v4 = vld [vmem:[%s3225_s10 + $0x10] sm:$0xff] }
 0x38c   : > { %v1456_v6 = vmul.f32 1.442695, %v1455_v5 }
 0x38e   : > { %2379 = vpow2.f32 %v1456_v6  ;;  %v1764_v6 = vld [vmem:[%s3225_s10 + $0x18] sm:$0xff] }
 0x390   : > { %v2376_v7 = vpop.eup %2375 }
 0x391   : > { %v1123_v8 = vsel %vm873_vm2, %v2376_v7, 0.0 }
 0x392   : > { %1124 = vadd.xlane.f32.xlu0 %v1123_v8  ;;  %v1765_v8 = vld [vmem:[%s3225_s10 + $0x20] sm:$0xff] }
 0x394   : > { %v2378_v9 = vpop.eup %2377 }
 0x395   : > { %v1291_v11 = vsel %vm873_vm2, %v2378_v9, 0.0 }
 0x396   : > { %1292 = vadd.xlane.f32.xlu1 %v1291_v11 }
 0x398   : > { %v2380_v12 = vpop.eup %2379 }
 0x399   : > { %v1458_v13 = vsel %vm873_vm2, %v2380_v12, 0.0 }
 0x39a   : > { %1459 = vadd.xlane.f32.xlu0 %v1458_v13 }
 0x3a7   : > { %1463 = vrot.lane.b32.xlu1 %v3050_v26, %s2631_s21 }
 0x3b0   : > { %1296 = vrot.lane.b32.xlu0 %v3050_v26, %s2629_s18  ;;  %s3296_s18 = sld [smem:[#allocation26_spill]] }
 0x3b6   : > { %v961_v15 = vpop.xlane.xlu1 %960  ;;  %v2071_v33 = vld [vmem:[%s3296_s18] ss:$0 sm:$0xff]  ;;  %s2549_s18 = scalar_lea.vmem %s2548_s1, 256 }
 0x3b7   : > { %2381 = vrcp.f32 %v961_v15  ;;  %p2551_p4 = scmp.lt.s32.totalorder %s2549_s18, %s2543_s11 }
 0x3b9   : > { %p2552_p13 = por %p2551_p4, %p2550_p11 }
 0x3bb   : > { %p2553_p2 = pnand %p2552_p13, %p2546_p9 }
 0x3c1   : > { %v2382_v16 = vpop.eup %2381 }
 0x3c2   : > { %v963_v17 = vmul.f32 %v2382_v16, %v2374_v58 }
 0x3c4   : > { %2170 = vmatmul.mubr.msk.f32.vlgmr.msra.gmra.mrb[6].mxu1 %vm873_vm2, %v963_v17 }
 0x3c5   : > { %2178 = vmatpush3.msra.mxu1 %v1130_v14  ;;  %2179 = vmatprep.mubr.msk.f32.mxu1 %vm2627_vm0, %v2628_v1 }
 0x3c6   : > { %2187 = vmatprep.subr.mxu1 %v2628_v1 }
 0x41f   : > { %v1125_v18 = vpop.xlane.xlu0 %1124 }
 0x420   : > { %2383 = vrcp.f32 %v1125_v18 }
 0x423   : > { %v1293_v19 = vpop.xlane.xlu1 %1292 }
 0x424   : > { %2385 = vrcp.f32 %v1293_v19 }
 0x427   : > { %v1460_v20 = vpop.xlane.xlu0 %1459  ;;  %v1464_v26 = vpop.permute.xlu1 %1463 }
 0x428   : > { %2387 = vrcp.f32 %v1460_v20 }
 0x42a   : > { %v2384_v21 = vpop.eup %2383 }
 0x42b   : > { %v1127_v22 = vmul.f32 %v2384_v21, %v2376_v7  ;;  %v1297_v23 = vpop.permute.xlu0 %1296  ;;  %v2277_v7 = vpack.c.bf16 %v1764_v6, %v1763_v4  ;;  %v2067_v21 = vld [vmem:[%s3227_s12] ss:$0 sm:$0xff] }
 0x42d   : > { %2180 = vmatmul.mubr.msk.f32.vlgmr.msra.gmra.mrb[8].mxu1 %vm873_vm2, %v1127_v22 }
 0x42e   : > { %v2386_v24 = vpop.eup %2385  ;;  %2188 = vmatpush3.msra.mxu1 %v1297_v23  ;;  %2189 = vmatprep.mubr.msk.f32.mxu1 %vm2627_vm0, %v2628_v1 }
 0x42f   : > { %v1295_v25 = vmul.f32 %v2386_v24, %v2378_v9  ;;  %2197 = vmatprep.subr.mxu1 %v2628_v1  ;;  %v1766_v9 = vld [vmem:[%s3225_s10 + $0x28] sm:$0xff] }
 0x430   : > { %v2280_v11 = vpack.c.bf16 %v1766_v9, %v1765_v8 }
 0x431   : > { %2190 = vmatmul.mubr.msk.f32.vlgmr.msra.gmra.mrb[10].mxu1 %vm873_vm2, %v1295_v25  ;;  %v1767_v25 = vld [vmem:[%s3225_s10 + $0x30] sm:$0xff] }
 0x432   : > { %v2388_v27 = vpop.eup %2387  ;;  %2198 = vmatpush3.msra.mxu1 %v1464_v26  ;;  %2199 = vmatprep.mubr.msk.f32.mxu1 %vm2627_vm0, %v2628_v1  ;;  %v1768_v26 = vld [vmem:[%s3225_s10 + $0x38] sm:$0xff] }
 0x433   : > { %v1462_v28 = vmul.f32 %v2388_v27, %v2380_v12  ;;  %2267 = vmatprep.subr.bf16.mxu1 %v2626_v0  ;;  %v2283_v27 = vpack.c.bf16 %v1768_v26, %v1767_v25 }
 0x435   : > { %2200 = vmatmul.mubr.msk.f32.vlgmr.msra.gmra.mrb[12].mxu1 %vm873_vm2, %v1462_v28  ;;  %v2069_v28 = vld [vmem:[%s3295_s30] ss:$0 sm:$0xff]  ;;  %s3170_s30 = scalar_lea.hbm %s3300_s19, %s2076_s14 }
 0x436   : > { %2221 = vmatprep.mubr.msk.f32.mxu1 %vm2627_vm0, %v2628_v1 }
 0x497   : > { %v1033_v29 = vpop.f32.mrb[6].mxu1 }
 0x498   : > { %v2171_v30 = vpop.f32.mrb[7].mxu1 }
 0x500   : > { %v1201_v37 = vpop.f32.mrb[8].mxu1 }
 0x501   : > { %1540 = vrot.lane.b32.xlu1 %v1201_v37, %s2632_s9  ;;  %v2181_v38 = vpop.f32.mrb[9].mxu1 }
 0x504   : > { %v1368_v39 = vpop.f32.mrb[10].mxu1 }
 0x505   : > { %1544 = vrot.lane.b32.xlu0 %v1368_v39, %s2633_s6  ;;  %v2191_v40 = vpop.f32.mrb[11].mxu1  ;;  %s3298_s6 = sld [smem:[#allocation28_spill]] }
 0x508   : > { %v1535_v41 = vpop.f32.mrb[12].mxu1 }
 0x509   : > { %1548 = vrot.lane.b32.xlu1 %v1535_v41, %s2634_s29  ;;  %v2201_v42 = vpop.f32.mrb[13].mxu1 }
 0x573   : > { %v1541_v43 = vpop.permute.xlu1 %1540 }
 0x574   : > { %v1551_v45 = vsel %vm873_vm2, %v1033_v29, %v1541_v43 }
 0x577   : > { %v1545_v44 = vpop.permute.xlu0 %1544 }
 0x578   : > { %v1553_v46 = vsel %vm1552_vm4, %v1551_v45, %v1545_v44 }
 0x57b   : > { %v1549_v47 = vpop.permute.xlu1 %1548 }
 0x57c   : > { %v1555_v48 = vsel %vm1554_vm5, %v1553_v46, %v1549_v47 }
 0x57d   : > { %2211 = vmatmul.mubr.msk.f32.vlgmr.msra.gmra.mrb[8].mxu0 %vm648_vm1, %v1555_v48 }
 0x57e   : > { %2240 = vmatprep.mubr.msk.f32.mxu0 %vm2627_vm0, %v2628_v1  ;;  %v1676_v1 = vld [vmem:[#allocation10] sm:$0xff] }
 0x57f   : > { %v2268_v62 = vpack.c.bf16 %v1677_v60, %v1676_v1 }
 0x581   : > { %2269 = vmatpush3.bf16.msra.mxu1 %v2268_v62 }
 0x582   : > { %2270 = vmatprep.subr.bf16.mxu1 %v2626_v0 }
 0x585   : > { %2272 = vmatpush3.bf16.msra.mxu1 %v2271_v2 }
 0x650   : > { %v1636_v50 = vpop.f32.mrb[8].mxu0 }
 0x651   : > { %v1637_v51 = vadd.f32 %v2065_v49, %v1636_v50  ;;  %v2212_v52 = vpop.f32.mrb[9].mxu0 }
 0x653   : > { %v1640_v53 = vadd.f32 %v1637_v51, %v3001_v10  ;;  %v1761_v10 = vld [vmem:[%s3225_s10] sm:$0xff] }
 0x654   : > { %v2274_v5 = vpack.c.bf16 %v1762_v3, %v1761_v10 }
 0x655   : > { %v1641_v54 = vsel %vm648_vm1, %v1640_v53, 0.0 }
 0x656   : > { %1642 = vadd.xlane.f32.xlu0 %v1641_v54  ;;  %2275 = vmatpush3.bf16.msra.mxu0 %v2274_v5 }
 0x657   : > { %2276 = vmatprep.subr.bf16.mxu0 %v2626_v0 }
 0x65a   : > { %2278 = vmatpush3.bf16.msra.mxu0 %v2277_v7 }
 0x65b   : > { %2279 = vmatprep.subr.bf16.mxu0 %v2626_v0 }
 0x65e   : > { %2281 = vmatpush3.bf16.msra.mxu0 %v2280_v11 }
 0x65f   : > { %2282 = vmatprep.subr.bf16.mxu0 %v2626_v0  ;;  %v2068_v0 = vld [vmem:[%s3294_s27] ss:$0 sm:$0xff]  ;;  %s3299_s27 = sld [smem:[#allocation29_spill]] }
 0x662   : > { %2284 = vmatpush3.bf16.msra.mxu0 %v2283_v27 }
 0x6e3   : > { %v1643_v55 = vpop.xlane.xlu0 %1642 }
 0x6e4   : > { %v1645_v56 = vmul.f32 0.03125, %v1643_v55  ;;  %v2074_v55 = vld [vmem:[%s3299_s27] ss:$0 sm:$0xff] }
 0x6e6   : > { %v1646_v57 = vsub.f32 %v1640_v53, %v1645_v56  ;;  %v2073_v53 = vld [vmem:[%s3298_s6] ss:$0 sm:$0xff] }
 0x6e8   : > { %v1647_v58 = vmul.f32 %v1646_v57, %v1646_v57 }
 0x6ea   : > { %v1648_v59 = vsel %vm648_vm1, %v1647_v58, 0.0 }
 0x6eb   : > { %1649 = vadd.xlane.f32.xlu1 %v1648_v59 }
 0x778   : > { %v1650_v12 = vpop.xlane.xlu1 %1649 }
 0x779   : > { %v1651_v13 = vmul.f32 0.03125, %v1650_v12 }
 0x77b   : > { %v1652_v14 = vadd.f32 1e-05, %v1651_v13 }
 0x77d   : > { %2389 = vrsqrt.f32 %v1652_v14  ;;  %vm1655_vm6 = vcmp.eq.f32.partialorder %v1652_v14, inf  ;;  %v1658_v17 = vand.u32 2147483648, %v1652_v14  ;;  %vm1657_vm7 = vcmp.eq.f32.partialorder %v1652_v14, 0.0 }
 0x787   : > { %v2390_v15 = vpop.eup %2389 }
 0x788   : > { %v1654_v16 = vmul.f32 %v2390_v15, %v1652_v14 }
 0x78a   : > { %v1656_v18 = vsel %vm1655_vm6, %v1652_v14, %v1654_v16 }
 0x78b   : > { %v1659_v19 = vsel %vm1657_vm7, %v1658_v17, %v1656_v18 }
 0x78c   : > { %2391 = vrcp.f32 %v1659_v19 }
 0x796   : > { %v2392_v20 = vpop.eup %2391 }
 0x797   : > { %v1661_v22 = vmul.f32 %v2392_v20, %v1646_v57 }
 0x799   : > { %v1668_v23 = vmul.f32 %v2067_v21, %v1661_v22 }
 0x79b   : > { %v1675_v24 = vadd.f32 %v2068_v0, %v1668_v23 }
 0x79d   : > { %2222 = vmatmul.mubr.msk.f32.vlgmr.msra.gmra.mrb[14].mxu1 %vm648_vm1, %v1675_v24 }
 0x870   : > { %v1756_v29 = vpop.f32.mrb[14].mxu1 }
 0x871   : > { %v1757_v30 = vadd.f32 %v2069_v28, %v1756_v29  ;;  %v2223_v31 = vpop.f32.mrb[15].mxu1 }
 0x873   : > { %v1760_v32 = vmax.f32 %v1757_v30, 0.0 }
 0x875   : > { %2241 = vmatmul.mubr.msk.f32.vlgmr.msra.gmra.mrb[10].mxu0 %vm1776_vm8, %v1760_v32 }
 0x948   : > { %v1846_v34 = vpop.f32.mrb[10].mxu0 }
 0x949   : > { %v1847_v35 = vadd.f32 %v2071_v33, %v1846_v34  ;;  %v2242_v36 = vpop.f32.mrb[11].mxu0 }
 0x94b   : > { %v1850_v37 = vadd.f32 %v1847_v35, %v1675_v24 }
 0x94d   : > { %v1851_v38 = vsel %vm648_vm1, %v1850_v37, 0.0 }
 0x94e   : > { %1852 = vadd.xlane.f32.xlu0 %v1851_v38 }
 0x9db   : > { %v1853_v39 = vpop.xlane.xlu0 %1852 }
 0x9dc   : > { %v1854_v40 = vmul.f32 0.03125, %v1853_v39 }
 0x9de   : > { %v1855_v41 = vsub.f32 %v1850_v37, %v1854_v40 }
 0x9e0   : > { %v1856_v42 = vmul.f32 %v1855_v41, %v1855_v41 }
 0x9e2   : > { %v1857_v43 = vsel %vm648_vm1, %v1856_v42, 0.0 }
 0x9e3   : > { %1858 = vadd.xlane.f32.xlu0 %v1857_v43 }
 0xa70   : > { %v1859_v44 = vpop.xlane.xlu0 %1858 }
 0xa71   : > { %v1860_v45 = vmul.f32 0.03125, %v1859_v44 }
 0xa73   : > { %v1861_v46 = vadd.f32 1e-05, %v1860_v45 }
 0xa75   : > { %2393 = vrsqrt.f32 %v1861_v46  ;;  %vm1864_vm9 = vcmp.eq.f32.partialorder %v1861_v46, inf  ;;  %v1867_v49 = vand.u32 2147483648, %v1861_v46  ;;  %vm1866_vm10 = vcmp.eq.f32.partialorder %v1861_v46, 0.0 }
 0xa7f   : > { %v2394_v47 = vpop.eup %2393 }
 0xa80   : > { %v1863_v48 = vmul.f32 %v2394_v47, %v1861_v46 }
 0xa82   : > { %v1865_v50 = vsel %vm1864_vm9, %v1861_v46, %v1863_v48 }
 0xa83   : > { %v1868_v51 = vsel %vm1866_vm10, %v1867_v49, %v1865_v50 }
 0xa84   : > { %2395 = vrcp.f32 %v1868_v51 }
 0xa8e   : > { %v2396_v52 = vpop.eup %2395 }
 0xa8f   : > { %v1870_v54 = vmul.f32 %v2396_v52, %v1855_v41 }
 0xa91   : > { %v1877_v56 = vmul.f32 %v2073_v53, %v1870_v54 }
 0xa93   : > { %v1884_v57 = vadd.f32 %v2074_v55, %v1877_v56 }
 0xa95   : > { %1885 = vst.msk [vmem:[%s636_s20] sm:$0xff] %vm648_vm1, %v1884_v57 }
 0xa96   : > { %2556 = shalt.err (!%p2553_p2)
}
 0xa97   : > { %s2557_s26 = scalar_lea.hbm %s3170_s30, 128  ;;  %s2561_s6 = scalar_lea.hbm %s3300_s19, 256 }
 0xa98   : > { %p2558_p5 = scmp.ne.s32.totalorder %s3170_s30, %s2557_s26  ;;  %p2562_p0 = scmp.lt.u32.totalorder %s3170_s30, %s3300_s19 }
 0xa99   : > { %p2563_p7 = scmp.lt.u32.totalorder %s2561_s6, %s2557_s26  ;;  %p2565_p6 = scmp.lt.u32.totalorder %s2557_s26, %s3170_s30 }
 0xa9a   : > { %p2559_p12 = pnand %p2558_p5, %p3301_p10 }
 0xa9b   : > { %p2564_p1 = por %p2563_p7, %p2562_p0 }
 0xa9c   : > { %p2560_p3 = pneg %p2559_p12 }
 0xa9d   : > { %p2566_p8 = por %p2565_p6, %p2564_p1 }
 0xa9f   : > { %p2567_p9 = pnand %p2566_p8, %p2560_p3 }
 0xaa1   : > { %2570 = shalt.err (!%p2567_p9)
}
 0xaa2   : > { %2299 = dma.vmem_to_hbm [thread:$0]  (%p3301_p10), %s3172_s17, 128, %s3170_s30, %s1887_s0  }
 0xaa3 PF: > { %s3302_s27 = sld [smem:[#allocation16_spill]]  ;;  %s3303_s14 = sld [smem:[#allocation18_spill]] }
 0xaa4   : > { %s3304_s20 = sld [smem:[#allocation17_spill]] }
 0xaa9   : > { %s1912_s15 = sand.u32 1, %s3302_s27   ;;  %p3305_p11 = scmp.ne.s32.totalorder %s3303_s14, 0 }
 0xaaa   : > { %p3306_p4 = scmp.ge.s32.totalorder %s3304_s20, 2  ;;  %s1913_s13 = scalar_lea.sflag [#allocation4], %s1912_s15 }
 0xaac   : > { %p2319_p13 = pnand %p3306_p4, %p3305_p11 }
 0xaae   : > { %2600 = dma.done.wait (!%p2319_p13), %s1913_s13, 128  }
 0xaaf   : > { %2602 = vsyncadd (!%p2319_p13), %s1913_s13, 4294967168  ;;  %s3307_s24 = sld [smem:[#allocation19_spill]]  ;;  %s3308_s11 = sld [smem:[#allocation20_spill]] }
 0xab0   : > { %s3309_s21 = smov %s2609_s22  ;;  %s3310_s22 = smov %s2613_s23 }
 0xab5   : > { %p33_p2 = scmp.ge.s32.totalorder %s3307_s24, 4   ;;  %s3311_s23 = smov %s3308_s11 }
 0xab7   :  { %35 = sbr.rel (!%p33_p2) target bundleno = 18 (0x12), region = 161 }
 0xabe   :  { %1918 = vsyncpa [#allocation3], 1 }
 0xabf   :  { %1920 = vsyncpa [#allocation3 + $0x1], 1 }
 0xac0   :  { %1921 = vsyncpa [#allocation6], 1 }
 0xac1   :  { %1923 = vsyncpa [#allocation6 + $0x1], 1 }
 0xac2   :  { %1924 = vsyncpa [#allocation9], 1 }
 0xac3   :  { %1925 = vsyncpa [#allocation4], 1 }
 0xac4   :  { %1927 = vsyncpa [#allocation4 + $0x1], 1 }

</bundles_post_ra>
